<compile_context>
chip_gen: v7x
topology: tpu7x:2x2x1
jax: 0.10.0
libtpu: 0.0.40
codegen_flags: <defaults>
</compile_context>

<pallas_src>
import functools

import numpy as np
import jax
import jax.numpy as jnp
from jax import lax
from jax.experimental import pallas as pl
from jax.experimental.pallas import tpu as pltpu

LRELU_SLOPE = 0.2
BN_EPS = 1e-5
LANE = 128


def _round_up(x, m):
    return ((x + m - 1) // m) * m


def _pad_to(x, shape):
    return jnp.pad(x, [(0, t - s) for s, t in zip(x.shape, shape)])


# --------------------------------------------------------------------------- #
# Fused kernel: conv0 + LeakyReLU, (conv + BN + LeakyReLU) x num_mid, 1x1 conv #
# --------------------------------------------------------------------------- #
def _fused_disc_kernel(*refs, num_mid, cout_pads):
    refs = list(refs)
    p1_ref, w1_ref, b1_ref = refs[0], refs[1], refs[2]
    idx = 3
    mids = []
    for _ in range(num_mid):
        mids.append(tuple(refs[idx:idx + 4]))  # (S, W_packed, bn_scale, bn_shift)
        idx += 4
    wf_ref, bf_ref, o_ref = refs[idx], refs[idx + 1], refs[idx + 2]

    # ---- Layer 0: im2col matmul (patches built in wrapper) + bias + LeakyReLU.
    h = jnp.dot(p1_ref[...], w1_ref[...], preferred_element_type=jnp.float32)
    h = h + b1_ref[...]
    h = jnp.maximum(h, LRELU_SLOPE * h)          # LeakyReLU(0.2)

    # ---- Middle layers: Conv(k=4,s=2,p=1) + BatchNorm(eval) + LeakyReLU.
    # The im2col gather is expressed as 16 tap-selection matmuls on the
    # VMEM-resident activations: acc = sum_tap (S_tap @ h) @ W_tap.
    for (s_ref, w_ref, sc_ref, sh_ref), cp in zip(mids, cout_pads):
        acc = None
        for tap in range(16):
            p_tap = jnp.dot(s_ref[tap], h, preferred_element_type=jnp.float32)
            contrib = jnp.dot(p_tap, w_ref[:, tap * cp:(tap + 1) * cp],
                              preferred_element_type=jnp.float32)
            acc = contrib if acc is None else acc + contrib
        # TODO(synk): BatchNorm2d applied in inference mode (running stats
        # folded into per-channel scale/shift); train-mode batch statistics
        # are not computed in-kernel.
        h = acc * sc_ref[...] + sh_ref[...]
        h = jnp.maximum(h, LRELU_SLOPE * h)

    # ---- Final 1x1 conv -> lane-dense (padded to 128) output slab.
    out = jnp.dot(h, wf_ref[...], preferred_element_type=jnp.float32) + bf_ref[...]
    o_ref[...] = out.astype(o_ref.dtype)


# --------------------------------------------------------------------------- #
# Wrapper                                                                      #
# --------------------------------------------------------------------------- #
def _build_tap_gather(n, h_in, w_in):
    """0/1 selection matrices mapping previous-layer rows -> per-tap patch rows
    for a 4x4 / stride-2 / pad-1 conv.  Shape (16, M_out, M_in), trace-time np."""
    h_out, w_out = h_in // 2, w_in // 2
    m_in, m_out = n * h_in * w_in, n * h_out * w_out
    s = np.zeros((16, m_out, m_in), np.float32)
    for b in range(n):
        for yo in range(h_out):
            for xo in range(w_out):
                mo = (b * h_out + yo) * w_out + xo
                for kh in range(4):
                    yi = 2 * yo - 1 + kh
                    if not (0 <= yi < h_in):
                        continue
                    for kw in range(4):
                        xi = 2 * xo - 1 + kw
                        if not (0 <= xi < w_in):
                            continue
                        s[kh * 4 + kw, mo, (b * h_in + yi) * w_in + xi] = 1.0
    return jnp.asarray(s)


@jax.jit
def discriminator_forward(params, x_nchw):
    n, cin, h, w = x_nchw.shape
    x = jnp.transpose(x_nchw, (0, 2, 3, 1)).astype(jnp.float32)   # NCHW -> NHWC

    base = params["conv0"]["w"].shape[-1]
    num_mid = len(params["mid"])

    # Layer-0 im2col in the wrapper (the only layer whose input lives in HBM).
    ho, wo = h // 2, w // 2
    xp = jnp.pad(x, ((0, 0), (1, 1), (1, 1), (0, 0)))
    taps = [xp[:, kh:kh + 2 * ho:2, kw:kw + 2 * wo:2, :]
            for kh in range(4) for kw in range(4)]
    patches = jnp.stack(taps, axis=-2).reshape(n * ho * wo, 16 * cin)

    k1p = _round_up(16 * cin, LANE)
    c0p = _round_up(base, LANE)
    p1 = _pad_to(patches, (n * ho * wo, k1p))
    w1 = _pad_to(params["conv0"]["w"].reshape(16 * cin, base), (k1p, c0p))
    b1 = _pad_to(params["conv0"]["b"].reshape(1, base), (1, c0p))

    inputs = [p1, w1, b1]
    cout_pads = []
    cur_cp, cur_h, cur_w = c0p, ho, wo
    for layer in params["mid"]:
        cin_l, cout_l = layer["w"].shape[2], layer["w"].shape[3]
        cinp, coutp = _round_up(cin_l, LANE), _round_up(cout_l, LANE)
        assert cinp == cur_cp

        s_mat = _build_tap_gather(n, cur_h, cur_w)                 # (16, Mo, Mi)
        w_pad = _pad_to(layer["w"], (4, 4, cinp, coutp))
        w_pack = (w_pad.reshape(16, cinp, coutp)
                       .transpose(1, 0, 2)
                       .reshape(cinp, 16 * coutp))                 # [:, tap*coutp + c]
        scale = layer["gamma"] / jnp.sqrt(layer["var"] + BN_EPS)
        shift = (layer["b"] - layer["mean"]) * scale + layer["beta"]
        inputs += [s_mat, w_pack,
                   _pad_to(scale.reshape(1, cout_l), (1, coutp)),
                   _pad_to(shift.reshape(1, cout_l), (1, coutp))]
        cout_pads.append(coutp)
        cur_cp = coutp
        cur_h, cur_w = cur_h // 2, cur_w // 2

    c_last = params["final"]["w"].shape[2]
    wf = _pad_to(params["final"]["w"].reshape(c_last, 1), (cur_cp, LANE))
    bf = _pad_to(params["final"]["b"].reshape(1, 1), (1, LANE))
    inputs += [wf, bf]

    m_out = n * cur_h * cur_w
    kernel = functools.partial(_fused_disc_kernel, num_mid=num_mid,
                               cout_pads=tuple(cout_pads))

    out = pl.pallas_call(
        kernel,
        out_shape=jax.ShapeDtypeStruct((m_out, LANE), jnp.float32),
        in_specs=[pl.BlockSpec(memory_space=pltpu.MemorySpace.VMEM)] * len(inputs),
        out_specs=pl.BlockSpec(memory_space=pltpu.MemorySpace.VMEM),
    )(*inputs)

    y = out[:, 0].reshape(n, cur_h, cur_w)          # real logit is lane 0
    return y[:, None, :, :]                          # NCHW (N, 1, Hf, Wf)


# --------------------------------------------------------------------------- #
# Params + pure-JAX reference                                                  #
# --------------------------------------------------------------------------- #
def init_discriminator_params(key, in_channels=3, base_channels=64, num_layers=4):
    keys = iter(jax.random.split(key, 6 * num_layers + 4))
    s = 0.1
    params = {
        "conv0": {
            "w": s * jax.random.normal(next(keys), (4, 4, in_channels, base_channels), jnp.float32),
            "b": s * jax.random.normal(next(keys), (base_channels,), jnp.float32),
        },
        "mid": [],
        "final": None,
    }
    c = base_channels
    for _ in range(1, num_layers):
        co = c * 2
        params["mid"].append({
            "w": s * jax.random.normal(next(keys), (4, 4, c, co), jnp.float32),
            "b": s * jax.random.normal(next(keys), (co,), jnp.float32),
            "gamma": 1.0 + s * jax.random.normal(next(keys), (co,), jnp.float32),
            "beta": s * jax.random.normal(next(keys), (co,), jnp.float32),
            "mean": s * jax.random.normal(next(keys), (co,), jnp.float32),
            "var": 0.5 + jax.random.uniform(next(keys), (co,), jnp.float32),
        })
        c = co
    params["final"] = {
        "w": s * jax.random.normal(next(keys), (1, 1, c, 1), jnp.float32),
        "b": s * jax.random.normal(next(keys), (1,), jnp.float32),
    }
    return params


def discriminator_reference(params, x_nchw):
    x = jnp.transpose(x_nchw, (0, 2, 3, 1))
    dn = ("NHWC", "HWIO", "NHWC")

    def sconv(h, w, b):
        y = lax.conv_general_dilated(h, w, window_strides=(2, 2),
                                     padding=((1, 1), (1, 1)),
                                     dimension_numbers=dn)
        return y + b[None, None, None, :]

    def lrelu(v):
        return jnp.maximum(v, LRELU_SLOPE * v)

    h = lrelu(sconv(x, params["conv0"]["w"], params["conv0"]["b"]))
    for layer in params["mid"]:
        h = sconv(h, layer["w"], layer["b"])
        h = (h - layer["mean"]) / jnp.sqrt(layer["var"] + BN_EPS) * layer["gamma"] + layer["beta"]
        h = lrelu(h)
    y = lax.conv_general_dilated(h, params["final"]["w"], window_strides=(1, 1),
                                 padding="VALID", dimension_numbers=dn)
    y = y + params["final"]["b"][None, None, None, :]
    return jnp.transpose(y, (0, 3, 1, 2))


if __name__ == "__main__":
    # Small shapes consistent with the module: batch=2, in_channels=3,
    # spatial=16, base_channels=32, and the file-level `num_layers = 2`.
    IN_C, BASE_C, NUM_LAYERS = 3, 32, 2
    key = jax.random.PRNGKey(0)
    k_params, k_input = jax.random.split(key)

    params = init_discriminator_params(k_params, IN_C, BASE_C, NUM_LAYERS)
    x = jax.random.normal(k_input, (2, IN_C, 16, 16), jnp.float32)   # NCHW like PyTorch

    out = jax.block_until_ready(discriminator_forward(params, x))
    assert out.shape == (2, 1, 4, 4), out.shape

    ref = jax.block_until_ready(discriminator_reference(params, x))
    assert jnp.allclose(out, ref, atol=1e-4, rtol=1e-4), float(jnp.max(jnp.abs(out - ref)))

    print("KERNEL_OK")
</pallas_src>

<mosaic_0001>
module attributes {stable_mosaic.version = 11 : i64} {
  func.func @_fused_disc_kernel(%arg0: memref<128x128xf32, #tpu.memory_space<vmem>>, %arg1: memref<128x128xf32, #tpu.memory_space<vmem>>, %arg2: memref<1x128xf32, #tpu.memory_space<vmem>>, %arg3: memref<16x32x128xf32, #tpu.memory_space<vmem>>, %arg4: memref<128x2048xf32, #tpu.memory_space<vmem>>, %arg5: memref<1x128xf32, #tpu.memory_space<vmem>>, %arg6: memref<1x128xf32, #tpu.memory_space<vmem>>, %arg7: memref<128x128xf32, #tpu.memory_space<vmem>>, %arg8: memref<1x128xf32, #tpu.memory_space<vmem>>, %arg9: memref<32x128xf32, #tpu.memory_space<vmem>>) attributes {dimension_semantics = [], scalar_prefetch = 0 : i64, scratch_operands = 0 : i64, tpu.core_type = #tpu.core_type<tc>} {
    %c0 = arith.constant 0 : index
    %c0_0 = arith.constant 0 : index
    %0 = vector.load %arg0[%c0, %c0_0] : memref<128x128xf32, #tpu.memory_space<vmem>>, vector<128x128xf32>
    %c0_1 = arith.constant 0 : index
    %c0_2 = arith.constant 0 : index
    %1 = vector.load %arg1[%c0_1, %c0_2] : memref<128x128xf32, #tpu.memory_space<vmem>>, vector<128x128xf32>
    %cst = arith.constant dense<0.000000e+00> : vector<128x128xf32>
    %2 = tpu.matmul %0, %1, %cst {dimension_numbers = #tpu.dot_dimension_numbers<[1], [0], [0], [1], [0, 0, 1, 1], [], []>} : vector<128x128xf32>, vector<128x128xf32>, vector<128x128xf32> -> vector<128x128xf32>
    %c0_3 = arith.constant 0 : index
    %c0_4 = arith.constant 0 : index
    %3 = vector.load %arg2[%c0_3, %c0_4] : memref<1x128xf32, #tpu.memory_space<vmem>>, vector<1x128xf32>
    %4 = vector.broadcast %3 : vector<1x128xf32> to vector<128x128xf32>
    %5 = arith.addf %2, %4 : vector<128x128xf32>
    %cst_5 = arith.constant 2.000000e-01 : f32
    %6 = vector.broadcast %cst_5 : f32 to vector<128x128xf32>
    %7 = arith.mulf %6, %5 : vector<128x128xf32>
    %8 = arith.maximumf %5, %7 : vector<128x128xf32>
    %c0_6 = arith.constant 0 : index
    %c0_7 = arith.constant 0 : index
    %c0_8 = arith.constant 0 : index
    %9 = vector.load %arg3[%c0_6, %c0_7, %c0_8] : memref<16x32x128xf32, #tpu.memory_space<vmem>>, vector<1x32x128xf32>
    %10 = vector.shape_cast %9 : vector<1x32x128xf32> to vector<32x128xf32>
    %cst_9 = arith.constant dense<0.000000e+00> : vector<32x128xf32>
    %11 = tpu.matmul %10, %8, %cst_9 {dimension_numbers = #tpu.dot_dimension_numbers<[1], [0], [0], [1], [0, 0, 1, 1], [], []>} : vector<32x128xf32>, vector<128x128xf32>, vector<32x128xf32> -> vector<32x128xf32>
    %c0_10 = arith.constant 0 : index
    %c0_11 = arith.constant 0 : index
    %12 = vector.load %arg4[%c0_10, %c0_11] : memref<128x2048xf32, #tpu.memory_space<vmem>>, vector<128x128xf32>
    %cst_12 = arith.constant dense<0.000000e+00> : vector<32x128xf32>
    %13 = tpu.matmul %11, %12, %cst_12 {dimension_numbers = #tpu.dot_dimension_numbers<[1], [0], [0], [1], [0, 0, 1, 1], [], []>} : vector<32x128xf32>, vector<128x128xf32>, vector<32x128xf32> -> vector<32x128xf32>
    %c1 = arith.constant 1 : index
    %c0_13 = arith.constant 0 : index
    %c0_14 = arith.constant 0 : index
    %14 = vector.load %arg3[%c1, %c0_13, %c0_14] : memref<16x32x128xf32, #tpu.memory_space<vmem>>, vector<1x32x128xf32>
    %15 = vector.shape_cast %14 : vector<1x32x128xf32> to vector<32x128xf32>
    %cst_15 = arith.constant dense<0.000000e+00> : vector<32x128xf32>
    %16 = tpu.matmul %15, %8, %cst_15 {dimension_numbers = #tpu.dot_dimension_numbers<[1], [0], [0], [1], [0, 0, 1, 1], [], []>} : vector<32x128xf32>, vector<128x128xf32>, vector<32x128xf32> -> vector<32x128xf32>
    %c0_16 = arith.constant 0 : index
    %c128 = arith.constant 128 : index
    %17 = vector.load %arg4[%c0_16, %c128] : memref<128x2048xf32, #tpu.memory_space<vmem>>, vector<128x128xf32>
    %cst_17 = arith.constant dense<0.000000e+00> : vector<32x128xf32>
    %18 = tpu.matmul %16, %17, %cst_17 {dimension_numbers = #tpu.dot_dimension_numbers<[1], [0], [0], [1], [0, 0, 1, 1], [], []>} : vector<32x128xf32>, vector<128x128xf32>, vector<32x128xf32> -> vector<32x128xf32>
    %19 = arith.addf %13, %18 : vector<32x128xf32>
    %c2 = arith.constant 2 : index
    %c0_18 = arith.constant 0 : index
    %c0_19 = arith.constant 0 : index
    %20 = vector.load %arg3[%c2, %c0_18, %c0_19] : memref<16x32x128xf32, #tpu.memory_space<vmem>>, vector<1x32x128xf32>
    %21 = vector.shape_cast %20 : vector<1x32x128xf32> to vector<32x128xf32>
    %cst_20 = arith.constant dense<0.000000e+00> : vector<32x128xf32>
    %22 = tpu.matmul %21, %8, %cst_20 {dimension_numbers = #tpu.dot_dimension_numbers<[1], [0], [0], [1], [0, 0, 1, 1], [], []>} : vector<32x128xf32>, vector<128x128xf32>, vector<32x128xf32> -> vector<32x128xf32>
    %c0_21 = arith.constant 0 : index
    %c256 = arith.constant 256 : index
    %23 = vector.load %arg4[%c0_21, %c256] : memref<128x2048xf32, #tpu.memory_space<vmem>>, vector<128x128xf32>
    %cst_22 = arith.constant dense<0.000000e+00> : vector<32x128xf32>
    %24 = tpu.matmul %22, %23, %cst_22 {dimension_numbers = #tpu.dot_dimension_numbers<[1], [0], [0], [1], [0, 0, 1, 1], [], []>} : vector<32x128xf32>, vector<128x128xf32>, vector<32x128xf32> -> vector<32x128xf32>
    %25 = arith.addf %19, %24 : vector<32x128xf32>
    %c3 = arith.constant 3 : index
    %c0_23 = arith.constant 0 : index
    %c0_24 = arith.constant 0 : index
    %26 = vector.load %arg3[%c3, %c0_23, %c0_24] : memref<16x32x128xf32, #tpu.memory_space<vmem>>, vector<1x32x128xf32>
    %27 = vector.shape_cast %26 : vector<1x32x128xf32> to vector<32x128xf32>
    %cst_25 = arith.constant dense<0.000000e+00> : vector<32x128xf32>
    %28 = tpu.matmul %27, %8, %cst_25 {dimension_numbers = #tpu.dot_dimension_numbers<[1], [0], [0], [1], [0, 0, 1, 1], [], []>} : vector<32x128xf32>, vector<128x128xf32>, vector<32x128xf32> -> vector<32x128xf32>
    %c0_26 = arith.constant 0 : index
    %c384 = arith.constant 384 : index
    %29 = vector.load %arg4[%c0_26, %c384] : memref<128x2048xf32, #tpu.memory_space<vmem>>, vector<128x128xf32>
    %cst_27 = arith.constant dense<0.000000e+00> : vector<32x128xf32>
    %30 = tpu.matmul %28, %29, %cst_27 {dimension_numbers = #tpu.dot_dimension_numbers<[1], [0], [0], [1], [0, 0, 1, 1], [], []>} : vector<32x128xf32>, vector<128x128xf32>, vector<32x128xf32> -> vector<32x128xf32>
    %31 = arith.addf %25, %30 : vector<32x128xf32>
    %c4 = arith.constant 4 : index
    %c0_28 = arith.constant 0 : index
    %c0_29 = arith.constant 0 : index
    %32 = vector.load %arg3[%c4, %c0_28, %c0_29] : memref<16x32x128xf32, #tpu.memory_space<vmem>>, vector<1x32x128xf32>
    %33 = vector.shape_cast %32 : vector<1x32x128xf32> to vector<32x128xf32>
    %cst_30 = arith.constant dense<0.000000e+00> : vector<32x128xf32>
    %34 = tpu.matmul %33, %8, %cst_30 {dimension_numbers = #tpu.dot_dimension_numbers<[1], [0], [0], [1], [0, 0, 1, 1], [], []>} : vector<32x128xf32>, vector<128x128xf32>, vector<32x128xf32> -> vector<32x128xf32>
    %c0_31 = arith.constant 0 : index
    %c512 = arith.constant 512 : index
    %35 = vector.load %arg4[%c0_31, %c512] : memref<128x2048xf32, #tpu.memory_space<vmem>>, vector<128x128xf32>
    %cst_32 = arith.constant dense<0.000000e+00> : vector<32x128xf32>
    %36 = tpu.matmul %34, %35, %cst_32 {dimension_numbers = #tpu.dot_dimension_numbers<[1], [0], [0], [1], [0, 0, 1, 1], [], []>} : vector<32x128xf32>, vector<128x128xf32>, vector<32x128xf32> -> vector<32x128xf32>
    %37 = arith.addf %31, %36 : vector<32x128xf32>
    %c5 = arith.constant 5 : index
    %c0_33 = arith.constant 0 : index
    %c0_34 = arith.constant 0 : index
    %38 = vector.load %arg3[%c5, %c0_33, %c0_34] : memref<16x32x128xf32, #tpu.memory_space<vmem>>, vector<1x32x128xf32>
    %39 = vector.shape_cast %38 : vector<1x32x128xf32> to vector<32x128xf32>
    %cst_35 = arith.constant dense<0.000000e+00> : vector<32x128xf32>
    %40 = tpu.matmul %39, %8, %cst_35 {dimension_numbers = #tpu.dot_dimension_numbers<[1], [0], [0], [1], [0, 0, 1, 1], [], []>} : vector<32x128xf32>, vector<128x128xf32>, vector<32x128xf32> -> vector<32x128xf32>
    %c0_36 = arith.constant 0 : index
    %c640 = arith.constant 640 : index
    %41 = vector.load %arg4[%c0_36, %c640] : memref<128x2048xf32, #tpu.memory_space<vmem>>, vector<128x128xf32>
    %cst_37 = arith.constant dense<0.000000e+00> : vector<32x128xf32>
    %42 = tpu.matmul %40, %41, %cst_37 {dimension_numbers = #tpu.dot_dimension_numbers<[1], [0], [0], [1], [0, 0, 1, 1], [], []>} : vector<32x128xf32>, vector<128x128xf32>, vector<32x128xf32> -> vector<32x128xf32>
    %43 = arith.addf %37, %42 : vector<32x128xf32>
    %c6 = arith.constant 6 : index
    %c0_38 = arith.constant 0 : index
    %c0_39 = arith.constant 0 : index
    %44 = vector.load %arg3[%c6, %c0_38, %c0_39] : memref<16x32x128xf32, #tpu.memory_space<vmem>>, vector<1x32x128xf32>
    %45 = vector.shape_cast %44 : vector<1x32x128xf32> to vector<32x128xf32>
    %cst_40 = arith.constant dense<0.000000e+00> : vector<32x128xf32>
    %46 = tpu.matmul %45, %8, %cst_40 {dimension_numbers = #tpu.dot_dimension_numbers<[1], [0], [0], [1], [0, 0, 1, 1], [], []>} : vector<32x128xf32>, vector<128x128xf32>, vector<32x128xf32> -> vector<32x128xf32>
    %c0_41 = arith.constant 0 : index
    %c768 = arith.constant 768 : index
    %47 = vector.load %arg4[%c0_41, %c768] : memref<128x2048xf32, #tpu.memory_space<vmem>>, vector<128x128xf32>
    %cst_42 = arith.constant dense<0.000000e+00> : vector<32x128xf32>
    %48 = tpu.matmul %46, %47, %cst_42 {dimension_numbers = #tpu.dot_dimension_numbers<[1], [0], [0], [1], [0, 0, 1, 1], [], []>} : vector<32x128xf32>, vector<128x128xf32>, vector<32x128xf32> -> vector<32x128xf32>
    %49 = arith.addf %43, %48 : vector<32x128xf32>
    %c7 = arith.constant 7 : index
    %c0_43 = arith.constant 0 : index
    %c0_44 = arith.constant 0 : index
    %50 = vector.load %arg3[%c7, %c0_43, %c0_44] : memref<16x32x128xf32, #tpu.memory_space<vmem>>, vector<1x32x128xf32>
    %51 = vector.shape_cast %50 : vector<1x32x128xf32> to vector<32x128xf32>
    %cst_45 = arith.constant dense<0.000000e+00> : vector<32x128xf32>
    %52 = tpu.matmul %51, %8, %cst_45 {dimension_numbers = #tpu.dot_dimension_numbers<[1], [0], [0], [1], [0, 0, 1, 1], [], []>} : vector<32x128xf32>, vector<128x128xf32>, vector<32x128xf32> -> vector<32x128xf32>
    %c0_46 = arith.constant 0 : index
    %c896 = arith.constant 896 : index
    %53 = vector.load %arg4[%c0_46, %c896] : memref<128x2048xf32, #tpu.memory_space<vmem>>, vector<128x128xf32>
    %cst_47 = arith.constant dense<0.000000e+00> : vector<32x128xf32>
    %54 = tpu.matmul %52, %53, %cst_47 {dimension_numbers = #tpu.dot_dimension_numbers<[1], [0], [0], [1], [0, 0, 1, 1], [], []>} : vector<32x128xf32>, vector<128x128xf32>, vector<32x128xf32> -> vector<32x128xf32>
    %55 = arith.addf %49, %54 : vector<32x128xf32>
    %c8 = arith.constant 8 : index
    %c0_48 = arith.constant 0 : index
    %c0_49 = arith.constant 0 : index
    %56 = vector.load %arg3[%c8, %c0_48, %c0_49] : memref<16x32x128xf32, #tpu.memory_space<vmem>>, vector<1x32x128xf32>
    %57 = vector.shape_cast %56 : vector<1x32x128xf32> to vector<32x128xf32>
    %cst_50 = arith.constant dense<0.000000e+00> : vector<32x128xf32>
    %58 = tpu.matmul %57, %8, %cst_50 {dimension_numbers = #tpu.dot_dimension_numbers<[1], [0], [0], [1], [0, 0, 1, 1], [], []>} : vector<32x128xf32>, vector<128x128xf32>, vector<32x128xf32> -> vector<32x128xf32>
    %c0_51 = arith.constant 0 : index
    %c1024 = arith.constant 1024 : index
    %59 = vector.load %arg4[%c0_51, %c1024] : memref<128x2048xf32, #tpu.memory_space<vmem>>, vector<128x128xf32>
    %cst_52 = arith.constant dense<0.000000e+00> : vector<32x128xf32>
    %60 = tpu.matmul %58, %59, %cst_52 {dimension_numbers = #tpu.dot_dimension_numbers<[1], [0], [0], [1], [0, 0, 1, 1], [], []>} : vector<32x128xf32>, vector<128x128xf32>, vector<32x128xf32> -> vector<32x128xf32>
    %61 = arith.addf %55, %60 : vector<32x128xf32>
    %c9 = arith.constant 9 : index
    %c0_53 = arith.constant 0 : index
    %c0_54 = arith.constant 0 : index
    %62 = vector.load %arg3[%c9, %c0_53, %c0_54] : memref<16x32x128xf32, #tpu.memory_space<vmem>>, vector<1x32x128xf32>
    %63 = vector.shape_cast %62 : vector<1x32x128xf32> to vector<32x128xf32>
    %cst_55 = arith.constant dense<0.000000e+00> : vector<32x128xf32>
    %64 = tpu.matmul %63, %8, %cst_55 {dimension_numbers = #tpu.dot_dimension_numbers<[1], [0], [0], [1], [0, 0, 1, 1], [], []>} : vector<32x128xf32>, vector<128x128xf32>, vector<32x128xf32> -> vector<32x128xf32>
    %c0_56 = arith.constant 0 : index
    %c1152 = arith.constant 1152 : index
    %65 = vector.load %arg4[%c0_56, %c1152] : memref<128x2048xf32, #tpu.memory_space<vmem>>, vector<128x128xf32>
    %cst_57 = arith.constant dense<0.000000e+00> : vector<32x128xf32>
    %66 = tpu.matmul %64, %65, %cst_57 {dimension_numbers = #tpu.dot_dimension_numbers<[1], [0], [0], [1], [0, 0, 1, 1], [], []>} : vector<32x128xf32>, vector<128x128xf32>, vector<32x128xf32> -> vector<32x128xf32>
    %67 = arith.addf %61, %66 : vector<32x128xf32>
    %c10 = arith.constant 10 : index
    %c0_58 = arith.constant 0 : index
    %c0_59 = arith.constant 0 : index
    %68 = vector.load %arg3[%c10, %c0_58, %c0_59] : memref<16x32x128xf32, #tpu.memory_space<vmem>>, vector<1x32x128xf32>
    %69 = vector.shape_cast %68 : vector<1x32x128xf32> to vector<32x128xf32>
    %cst_60 = arith.constant dense<0.000000e+00> : vector<32x128xf32>
    %70 = tpu.matmul %69, %8, %cst_60 {dimension_numbers = #tpu.dot_dimension_numbers<[1], [0], [0], [1], [0, 0, 1, 1], [], []>} : vector<32x128xf32>, vector<128x128xf32>, vector<32x128xf32> -> vector<32x128xf32>
    %c0_61 = arith.constant 0 : index
    %c1280 = arith.constant 1280 : index
    %71 = vector.load %arg4[%c0_61, %c1280] : memref<128x2048xf32, #tpu.memory_space<vmem>>, vector<128x128xf32>
    %cst_62 = arith.constant dense<0.000000e+00> : vector<32x128xf32>
    %72 = tpu.matmul %70, %71, %cst_62 {dimension_numbers = #tpu.dot_dimension_numbers<[1], [0], [0], [1], [0, 0, 1, 1], [], []>} : vector<32x128xf32>, vector<128x128xf32>, vector<32x128xf32> -> vector<32x128xf32>
    %73 = arith.addf %67, %72 : vector<32x128xf32>
    %c11 = arith.constant 11 : index
    %c0_63 = arith.constant 0 : index
    %c0_64 = arith.constant 0 : index
    %74 = vector.load %arg3[%c11, %c0_63, %c0_64] : memref<16x32x128xf32, #tpu.memory_space<vmem>>, vector<1x32x128xf32>
    %75 = vector.shape_cast %74 : vector<1x32x128xf32> to vector<32x128xf32>
    %cst_65 = arith.constant dense<0.000000e+00> : vector<32x128xf32>
    %76 = tpu.matmul %75, %8, %cst_65 {dimension_numbers = #tpu.dot_dimension_numbers<[1], [0], [0], [1], [0, 0, 1, 1], [], []>} : vector<32x128xf32>, vector<128x128xf32>, vector<32x128xf32> -> vector<32x128xf32>
    %c0_66 = arith.constant 0 : index
    %c1408 = arith.constant 1408 : index
    %77 = vector.load %arg4[%c0_66, %c1408] : memref<128x2048xf32, #tpu.memory_space<vmem>>, vector<128x128xf32>
    %cst_67 = arith.constant dense<0.000000e+00> : vector<32x128xf32>
    %78 = tpu.matmul %76, %77, %cst_67 {dimension_numbers = #tpu.dot_dimension_numbers<[1], [0], [0], [1], [0, 0, 1, 1], [], []>} : vector<32x128xf32>, vector<128x128xf32>, vector<32x128xf32> -> vector<32x128xf32>
    %79 = arith.addf %73, %78 : vector<32x128xf32>
    %c12 = arith.constant 12 : index
    %c0_68 = arith.constant 0 : index
    %c0_69 = arith.constant 0 : index
    %80 = vector.load %arg3[%c12, %c0_68, %c0_69] : memref<16x32x128xf32, #tpu.memory_space<vmem>>, vector<1x32x128xf32>
    %81 = vector.shape_cast %80 : vector<1x32x128xf32> to vector<32x128xf32>
    %cst_70 = arith.constant dense<0.000000e+00> : vector<32x128xf32>
    %82 = tpu.matmul %81, %8, %cst_70 {dimension_numbers = #tpu.dot_dimension_numbers<[1], [0], [0], [1], [0, 0, 1, 1], [], []>} : vector<32x128xf32>, vector<128x128xf32>, vector<32x128xf32> -> vector<32x128xf32>
    %c0_71 = arith.constant 0 : index
    %c1536 = arith.constant 1536 : index
    %83 = vector.load %arg4[%c0_71, %c1536] : memref<128x2048xf32, #tpu.memory_space<vmem>>, vector<128x128xf32>
    %cst_72 = arith.constant dense<0.000000e+00> : vector<32x128xf32>
    %84 = tpu.matmul %82, %83, %cst_72 {dimension_numbers = #tpu.dot_dimension_numbers<[1], [0], [0], [1], [0, 0, 1, 1], [], []>} : vector<32x128xf32>, vector<128x128xf32>, vector<32x128xf32> -> vector<32x128xf32>
    %85 = arith.addf %79, %84 : vector<32x128xf32>
    %c13 = arith.constant 13 : index
    %c0_73 = arith.constant 0 : index
    %c0_74 = arith.constant 0 : index
    %86 = vector.load %arg3[%c13, %c0_73, %c0_74] : memref<16x32x128xf32, #tpu.memory_space<vmem>>, vector<1x32x128xf32>
    %87 = vector.shape_cast %86 : vector<1x32x128xf32> to vector<32x128xf32>
    %cst_75 = arith.constant dense<0.000000e+00> : vector<32x128xf32>
    %88 = tpu.matmul %87, %8, %cst_75 {dimension_numbers = #tpu.dot_dimension_numbers<[1], [0], [0], [1], [0, 0, 1, 1], [], []>} : vector<32x128xf32>, vector<128x128xf32>, vector<32x128xf32> -> vector<32x128xf32>
    %c0_76 = arith.constant 0 : index
    %c1664 = arith.constant 1664 : index
    %89 = vector.load %arg4[%c0_76, %c1664] : memref<128x2048xf32, #tpu.memory_space<vmem>>, vector<128x128xf32>
    %cst_77 = arith.constant dense<0.000000e+00> : vector<32x128xf32>
    %90 = tpu.matmul %88, %89, %cst_77 {dimension_numbers = #tpu.dot_dimension_numbers<[1], [0], [0], [1], [0, 0, 1, 1], [], []>} : vector<32x128xf32>, vector<128x128xf32>, vector<32x128xf32> -> vector<32x128xf32>
    %91 = arith.addf %85, %90 : vector<32x128xf32>
    %c14 = arith.constant 14 : index
    %c0_78 = arith.constant 0 : index
    %c0_79 = arith.constant 0 : index
    %92 = vector.load %arg3[%c14, %c0_78, %c0_79] : memref<16x32x128xf32, #tpu.memory_space<vmem>>, vector<1x32x128xf32>
    %93 = vector.shape_cast %92 : vector<1x32x128xf32> to vector<32x128xf32>
    %cst_80 = arith.constant dense<0.000000e+00> : vector<32x128xf32>
    %94 = tpu.matmul %93, %8, %cst_80 {dimension_numbers = #tpu.dot_dimension_numbers<[1], [0], [0], [1], [0, 0, 1, 1], [], []>} : vector<32x128xf32>, vector<128x128xf32>, vector<32x128xf32> -> vector<32x128xf32>
    %c0_81 = arith.constant 0 : index
    %c1792 = arith.constant 1792 : index
    %95 = vector.load %arg4[%c0_81, %c1792] : memref<128x2048xf32, #tpu.memory_space<vmem>>, vector<128x128xf32>
    %cst_82 = arith.constant dense<0.000000e+00> : vector<32x128xf32>
    %96 = tpu.matmul %94, %95, %cst_82 {dimension_numbers = #tpu.dot_dimension_numbers<[1], [0], [0], [1], [0, 0, 1, 1], [], []>} : vector<32x128xf32>, vector<128x128xf32>, vector<32x128xf32> -> vector<32x128xf32>
    %97 = arith.addf %91, %96 : vector<32x128xf32>
    %c15 = arith.constant 15 : index
    %c0_83 = arith.constant 0 : index
    %c0_84 = arith.constant 0 : index
    %98 = vector.load %arg3[%c15, %c0_83, %c0_84] : memref<16x32x128xf32, #tpu.memory_space<vmem>>, vector<1x32x128xf32>
    %99 = vector.shape_cast %98 : vector<1x32x128xf32> to vector<32x128xf32>
    %cst_85 = arith.constant dense<0.000000e+00> : vector<32x128xf32>
    %100 = tpu.matmul %99, %8, %cst_85 {dimension_numbers = #tpu.dot_dimension_numbers<[1], [0], [0], [1], [0, 0, 1, 1], [], []>} : vector<32x128xf32>, vector<128x128xf32>, vector<32x128xf32> -> vector<32x128xf32>
    %c0_86 = arith.constant 0 : index
    %c1920 = arith.constant 1920 : index
    %101 = vector.load %arg4[%c0_86, %c1920] : memref<128x2048xf32, #tpu.memory_space<vmem>>, vector<128x128xf32>
    %cst_87 = arith.constant dense<0.000000e+00> : vector<32x128xf32>
    %102 = tpu.matmul %100, %101, %cst_87 {dimension_numbers = #tpu.dot_dimension_numbers<[1], [0], [0], [1], [0, 0, 1, 1], [], []>} : vector<32x128xf32>, vector<128x128xf32>, vector<32x128xf32> -> vector<32x128xf32>
    %103 = arith.addf %97, %102 : vector<32x128xf32>
    %c0_88 = arith.constant 0 : index
    %c0_89 = arith.constant 0 : index
    %104 = vector.load %arg5[%c0_88, %c0_89] : memref<1x128xf32, #tpu.memory_space<vmem>>, vector<1x128xf32>
    %105 = vector.broadcast %104 : vector<1x128xf32> to vector<32x128xf32>
    %106 = arith.mulf %103, %105 : vector<32x128xf32>
    %c0_90 = arith.constant 0 : index
    %c0_91 = arith.constant 0 : index
    %107 = vector.load %arg6[%c0_90, %c0_91] : memref<1x128xf32, #tpu.memory_space<vmem>>, vector<1x128xf32>
    %108 = vector.broadcast %107 : vector<1x128xf32> to vector<32x128xf32>
    %109 = arith.addf %106, %108 : vector<32x128xf32>
    %cst_92 = arith.constant 2.000000e-01 : f32
    %110 = vector.broadcast %cst_92 : f32 to vector<32x128xf32>
    %111 = arith.mulf %110, %109 : vector<32x128xf32>
    %112 = arith.maximumf %109, %111 : vector<32x128xf32>
    %c0_93 = arith.constant 0 : index
    %c0_94 = arith.constant 0 : index
    %113 = vector.load %arg7[%c0_93, %c0_94] : memref<128x128xf32, #tpu.memory_space<vmem>>, vector<128x128xf32>
    %cst_95 = arith.constant dense<0.000000e+00> : vector<32x128xf32>
    %114 = tpu.matmul %112, %113, %cst_95 {dimension_numbers = #tpu.dot_dimension_numbers<[1], [0], [0], [1], [0, 0, 1, 1], [], []>} : vector<32x128xf32>, vector<128x128xf32>, vector<32x128xf32> -> vector<32x128xf32>
    %c0_96 = arith.constant 0 : index
    %c0_97 = arith.constant 0 : index
    %115 = vector.load %arg8[%c0_96, %c0_97] : memref<1x128xf32, #tpu.memory_space<vmem>>, vector<1x128xf32>
    %116 = vector.broadcast %115 : vector<1x128xf32> to vector<32x128xf32>
    %117 = arith.addf %114, %116 : vector<32x128xf32>
    %c0_98 = arith.constant 0 : index
    %c0_99 = arith.constant 0 : index
    %118 = vector.load %arg9[%c0_98, %c0_99] : memref<32x128xf32, #tpu.memory_space<vmem>>, vector<32x128xf32>
    tpu.vector_store %arg9[%c0_98, %c0_99], %117 {strides = array<i32>} : memref<32x128xf32, #tpu.memory_space<vmem>>, vector<32x128xf32>,
    return
  }
}

</mosaic_0001>

<bundles_post_ra>
// kernel: squeeze.1
= control target key start
LH: loop header
LB: loop body
LE: loop exit
PB: predicated region body
PF: predicated region fallthrough
CT: control target
= control target key end

     0   :  { %s146_s0 = inlined_call_operand.vmem [shape: f32[32], index: 0, kind: input, shape index: {}]   ;;  %s147_s1 = inlined_call_operand.hbm [shape: f32[2,1,4,4], index: 1, kind: output, shape index: {}]  }
   0x1   :  { %v5_v0 = vld [vmem:[%s146_s0] sm:$0x1] }
   0x2   :  { %6 = vst [vmem:[#allocation3] sm:$0x1] %v5_v0 }
   0x3   :  { %2 = vsyncpa [#allocation1], 0  ;;  %s105_s0 = smov 124   ;;  %s106_s8 = smov 116   ;;  %vm8_vm0 = vcmask 31744  }
   0x4   :  { %s107_s9 = smov 120   ;;  %s108_s10 = smov 112  }
   0x5   :  { %s109_s11 = smov 108   ;;  %s110_s12 = smov 104  }
   0x6   :  { %s111_s13 = smov 100   ;;  %s112_s14 = smov [#allocation0]  }
   0x7   :  { %s67_s15 = sshll.u32 %s112_s14, 4  ;;  %s68_s15 = int_to_ptr.vmem [resolvable:$true] %s67_s15 }
   0x8   :  { %s81_s16 = scalar_lea.vmem %s68_s15, 128  ;;  %p86_p1 = scmp.lt.s32.totalorder %s68_s15, %s68_s15 }
   0x9   :  { %v10_v1 = vld [vmem:[#allocation3] sm:$0x1]   ;;  %p82_p0 = scmp.ne.s32.totalorder %s68_s15, %s81_s16  ;;  %p87_p2 = scmp.lt.s32.totalorder %s81_s16, %s81_s16 }
   0xa   :  { %v22_v2 = vld [vmem:[#allocation3] sm:$0x1]   ;;  %11 = vrot.lane.b32.xlu0 %v10_v1, %s105_s0 }
   0xb   :  { %23 = vrot.lane.b32.xlu1 %v22_v2, %s106_s8  ;;  %v16_v3 = vld [vmem:[#allocation3] sm:$0x1]   ;;  %p88_p3 = por %p87_p2, %p86_p1 }
   0xc   :  { %v28_v4 = vld [vmem:[#allocation3] sm:$0x1]  }
   0xd   :  { %v7_v5 = vld [vmem:[#allocation3] sm:$0x1]   ;;  %p89_p4 = pnand %p88_p3, %p82_p0 }
   0xe   :  { %9 = vst.msk [vmem:[#allocation2] sm:$0x1] %vm8_vm0, %v7_v5   ;;  %17 = vrot.lane.b32.xlu0 %v16_v3, %s107_s9  ;;  %v34_v6 = vld [vmem:[#allocation3] sm:$0x1]  }
   0xf   :  { %29 = vrot.lane.b32.xlu1 %v28_v4, %s108_s10  ;;  %v40_v7 = vld [vmem:[#allocation3] sm:$0x1]  }
  0x10   :  { %v46_v8 = vld [vmem:[#allocation3] sm:$0x1]  }
  0x12   :  { %35 = vrot.lane.b32.xlu0 %v34_v6, %s109_s11 }
  0x13   :  { %41 = vrot.lane.b32.xlu1 %v40_v7, %s110_s12 }
  0x16   :  { %47 = vrot.lane.b32.xlu0 %v46_v8, %s111_s13 }
  0x7c   :  { %v12_v9 = vpop.permute.xlu0 %11  }
  0x7d   :  { %v24_v10 = vpop.permute.xlu1 %23   ;;  %15 = vst.msk [vmem:[#allocation2 + $0x1] sm:$0x1] %vm8_vm0, %v12_v9  }
  0x7e   :  { %27 = vst.msk [vmem:[#allocation2 + $0x3] sm:$0x1] %vm8_vm0, %v24_v10  }
  0x80   :  { %v18_v11 = vpop.permute.xlu0 %17  }
  0x81   :  { %v30_v12 = vpop.permute.xlu1 %29   ;;  %21 = vst.msk [vmem:[#allocation2 + $0x2] sm:$0x1] %vm8_vm0, %v18_v11  }
  0x82   :  { %33 = vst.msk [vmem:[#allocation2 + $0x8] sm:$0x1] %vm8_vm0, %v30_v12  }
  0x84   :  { %v36_v13 = vpop.permute.xlu0 %35  }
  0x85   :  { %v42_v14 = vpop.permute.xlu1 %41   ;;  %39 = vst.msk [vmem:[#allocation2 + $0x9] sm:$0x1] %vm8_vm0, %v36_v13  }
  0x86   :  { %45 = vst.msk [vmem:[#allocation2 + $0xa] sm:$0x1] %vm8_vm0, %v42_v14  }
  0x88   :  { %v48_v15 = vpop.permute.xlu0 %47   ;;  %v55_v16 = vld [vmem:[#allocation2] sm:$0xf] }
  0x89   :  { %51 = vst.msk [vmem:[#allocation2 + $0xb] sm:$0x1] %vm8_vm0, %v48_v15   ;;  %57 = vst [vmem:[#allocation0] sm:$0xf] %v55_v16 }
  0x90   :  { %v59_v17 = vld [vmem:[#allocation2 + $0x8] sm:$0xf] }
  0x91   :  { %62 = vst [vmem:[#allocation0 + $0x4] sm:$0xf] %v59_v17 }
  0x92   :  { %92 = shalt.err (!%p89_p4)
}
  0x93   :  { %s93_s19 = scalar_lea.hbm %s147_s1, 128 }
  0x94   :  { %p94_p5 = scmp.ne.s32.totalorder %s147_s1, %s93_s19  ;;  %p97_p6 = scmp.lt.u32.totalorder %s93_s19, %s147_s1 }
  0x96   :  { %p99_p7 = pnand %p97_p6, %p94_p5 }
  0x98   :  { %102 = shalt.err (!%p99_p7)
}
  0x99   :  { %70 = dma.vmem_to_hbm [thread:$0]  %s68_s15, 128, %s147_s1, [#allocation1]  }
  0x9a   :  { %103 = dma.done.wait [#allocation1], 128  }
  0x9b   :  { %104 = vsyncadd [#allocation1], 4294967168 }
  0x9c   :  { %72 = vsyncpa [#allocation1], 1 }

// kernel: discriminator_forward.1
= control target key start
LH: loop header
LB: loop body
LE: loop exit
PB: predicated region body
PF: predicated region fallthrough
CT: control target
= control target key end

     0   :  { %s8266_s1 = inlined_call_operand.vmem [shape: f32[128,128], index: 1, kind: input, shape index: {}]   ;;  %s8267_s0 = inlined_call_operand.vmem [shape: f32[128,128], index: 0, kind: input, shape index: {}]   ;;  %s8268_s3 = inlined_call_operand.vmem [shape: f32[16,32,128], index: 3, kind: input, shape index: {}]   ;;  %s8269_s2 = inlined_call_operand.vmem [shape: f32[1,128], index: 2, kind: input, shape index: {}]   ;;  %s8270_s4 = inlined_call_operand.vmem [shape: f32[128,2048], index: 4, kind: input, shape index: {}]   ;;  %s8271_s7 = inlined_call_operand.vmem [shape: f32[128,128], index: 7, kind: input, shape index: {}]   ;;  %s8272_s5 = inlined_call_operand.vmem [shape: f32[1,128], index: 5, kind: input, shape index: {}]   ;;  %s8273_s6 = inlined_call_operand.vmem [shape: f32[1,128], index: 6, kind: input, shape index: {}]   ;;  %s8274_s8 = inlined_call_operand.vmem [shape: f32[1,128], index: 8, kind: input, shape index: {}]   ;;  %s8275_s9 = inlined_call_operand.vmem [shape: f32[32,128], index: 9, kind: output, shape index: {}]  }
   0x1   :  { %v48_v0 = vld [vmem:[%s8266_s1] sm:$0xff]  ;;  %v49_v1 = vld [vmem:[%s8266_s1 + $0x8] sm:$0xff]  ;;  %v50_v2 = vld [vmem:[%s8266_s1 + $0x10] sm:$0xff] }
   0x2   :  { %v5571_v3 = vpack.c.bf16 %v49_v1, %v48_v0  ;;  %v51_v4 = vld [vmem:[%s8266_s1 + $0x18] sm:$0xff]  ;;  %v52_v6 = vld [vmem:[%s8266_s1 + $0x20] sm:$0xff]  ;;  %v53_v7 = vld [vmem:[%s8266_s1 + $0x28] sm:$0xff] }
   0x3   :  { %v5575_v5 = vpack.c.bf16 %v51_v4, %v50_v2  ;;  %v5579_v8 = vpack.c.bf16 %v53_v7, %v52_v6  ;;  %v32_v9 = vld [vmem:[%s8267_s0] sm:$0xff]  ;;  %v54_v10 = vld [vmem:[%s8266_s1 + $0x30] sm:$0xff]  ;;  %v55_v11 = vld [vmem:[%s8266_s1 + $0x38] sm:$0xff] }
   0x4   :  { %5572 = vmatprep.subr.bf16.mxu0 %v5571_v3  ;;  %4293 = vmatprep.mubr.f32.mxu0 %v32_v9  ;;  %v5583_v12 = vpack.c.bf16 %v55_v11, %v54_v10  ;;  %v56_v13 = vld [vmem:[%s8266_s1 + $0x40] sm:$0xff]  ;;  %v57_v14 = vld [vmem:[%s8266_s1 + $0x48] sm:$0xff]  ;;  %v58_v16 = vld [vmem:[%s8266_s1 + $0x50] sm:$0xff] }
   0x5   :  { %5574 = vmatpush3.bf16.msra.mxu0 %v5571_v3  ;;  %v5587_v15 = vpack.c.bf16 %v57_v14, %v56_v13  ;;  %v59_v17 = vld [vmem:[%s8266_s1 + $0x58] sm:$0xff]  ;;  %v60_v19 = vld [vmem:[%s8266_s1 + $0x60] sm:$0xff]  ;;  %v61_v20 = vld [vmem:[%s8266_s1 + $0x68] sm:$0xff] }
   0x6   :  { %5576 = vmatprep.subr.bf16.mxu0 %v5575_v5  ;;  %v5591_v18 = vpack.c.bf16 %v59_v17, %v58_v16  ;;  %v5595_v21 = vpack.c.bf16 %v61_v20, %v60_v19  ;;  %v62_v22 = vld [vmem:[%s8266_s1 + $0x70] sm:$0xff]  ;;  %v63_v23 = vld [vmem:[%s8266_s1 + $0x78] sm:$0xff]  ;;  %v33_v25 = vld [vmem:[%s8267_s0 + $0x8] sm:$0xff] }
   0x7   :  { %v5599_v24 = vpack.c.bf16 %v63_v23, %v62_v22  ;;  %v34_v26 = vld [vmem:[%s8267_s0 + $0x10] sm:$0xff]  ;;  %v35_v27 = vld [vmem:[%s8267_s0 + $0x18] sm:$0xff]  ;;  %v36_v28 = vld [vmem:[%s8267_s0 + $0x20] sm:$0xff] }
   0x8   :  { %v37_v29 = vld [vmem:[%s8267_s0 + $0x28] sm:$0xff]  ;;  %v38_v30 = vld [vmem:[%s8267_s0 + $0x30] sm:$0xff]  ;;  %v39_v31 = vld [vmem:[%s8267_s0 + $0x38] sm:$0xff] }
   0x9   :  { %5578 = vmatpush3.bf16.msra.mxu0 %v5575_v5  ;;  %v40_v32 = vld [vmem:[%s8267_s0 + $0x40] sm:$0xff]  ;;  %v41_v33 = vld [vmem:[%s8267_s0 + $0x48] sm:$0xff]  ;;  %v42_v34 = vld [vmem:[%s8267_s0 + $0x50] sm:$0xff] }
   0xa   :  { %5580 = vmatprep.subr.bf16.mxu0 %v5579_v8  ;;  %v43_v35 = vld [vmem:[%s8267_s0 + $0x58] sm:$0xff]  ;;  %v44_v36 = vld [vmem:[%s8267_s0 + $0x60] sm:$0xff]  ;;  %v45_v37 = vld [vmem:[%s8267_s0 + $0x68] sm:$0xff] }
   0xb   :  { %v46_v38 = vld [vmem:[%s8267_s0 + $0x70] sm:$0xff]  ;;  %v47_v39 = vld [vmem:[%s8267_s0 + $0x78] sm:$0xff]  ;;  %v3506_v40 = vld [vmem:[%s8268_s3 + $0x20] sm:$0xff] }
   0xc   :  { %v248_v41 = vld [vmem:[%s8268_s3] sm:$0xff] }
   0xd   :  { %5582 = vmatpush3.bf16.msra.mxu0 %v5579_v8  ;;  %4349 = vmatprep.mubr.f32.mxu1 %v248_v41  ;;  %v6874_v42 = vld [vmem:[%s8269_s2] ss:$0 sm:$0xff] }
   0xe   :  { %5584 = vmatprep.subr.bf16.mxu0 %v5583_v12 }
  0x11   :  { %5586 = vmatpush3.bf16.msra.mxu0 %v5583_v12 }
  0x12   :  { %5588 = vmatprep.subr.bf16.mxu0 %v5587_v15 }
  0x15   :  { %5590 = vmatpush3.bf16.msra.mxu0 %v5587_v15 }
  0x16   :  { %5592 = vmatprep.subr.bf16.mxu0 %v5591_v18 }
  0x19   :  { %5594 = vmatpush3.bf16.msra.mxu0 %v5591_v18 }
  0x1a   :  { %5596 = vmatprep.subr.bf16.mxu0 %v5595_v21 }
  0x1d   :  { %5598 = vmatpush3.bf16.msra.mxu0 %v5595_v21 }
  0x1e   :  { %5600 = vmatprep.subr.bf16.mxu0 %v5599_v24 }
  0x21   :  { %5602 = vmatpush3.bf16.msra.mxu0 %v5599_v24 }
  0x24   :  { %4294 = vmatmul.mubr.f32.vlgmr.msra.gmra.mrb[0].mxu0 %v33_v25 }
  0x25   :  { %4296 = vmatprep.mubr.f32.mxu0 %v34_v26 }
  0x28   :  { %4297 = vmatmul.mubr.f32.gmra.mrb[2].mxu0 %v35_v27 }
  0x29   :  { %4299 = vmatprep.mubr.f32.mxu0 %v36_v28 }
  0x2c   :  { %4300 = vmatmul.mubr.f32.gmra.mrb[4].mxu0 %v37_v29 }
  0x2d   :  { %4302 = vmatprep.mubr.f32.mxu0 %v38_v30 }
  0x30   :  { %4303 = vmatmul.mubr.f32.gmra.mrb[6].mxu0 %v39_v31 }
  0x31   :  { %4305 = vmatprep.mubr.f32.mxu0 %v40_v32 }
  0x34   :  { %4306 = vmatmul.mubr.f32.gmra.mrb[8].mxu0 %v41_v33 }
  0x35   :  { %4308 = vmatprep.mubr.f32.mxu0 %v42_v34 }
  0x38   :  { %4309 = vmatmul.mubr.f32.gmra.mrb[10].mxu0 %v43_v35 }
  0x39   :  { %4311 = vmatprep.mubr.f32.mxu0 %v44_v36 }
  0x3c   :  { %4312 = vmatmul.mubr.f32.gmra.mrb[12].mxu0 %v45_v37 }
  0x3d   :  { %4314 = vmatprep.mubr.f32.mxu0 %v46_v38 }
  0x40   :  { %4315 = vmatmul.mubr.f32.gmra.mrb[14].mxu0 %v47_v39 }
  0x41   :  { %4387 = vmatprep.mubr.f32.mxu0 %v3506_v40 }
  0xf7   :  { %v4295_v43 = vpop.f32.mrb[0].mxu0 }
  0xf8   :  { %v143_v44 = vadd.f32 %v4295_v43, %v6874_v42  ;;  %v137_v45 = vpop.f32.mrb[1].mxu0 }
  0xf9   :  { %v138_v46 = vadd.f32 %v6874_v42, %v137_v45 }
  0xfa   :  { %v217_v47 = vmul.f32 0.2, %v143_v44 }
  0xfb   :  { %v216_v48 = vmul.f32 0.2, %v138_v46  ;;  %v4298_v49 = vpop.f32.mrb[2].mxu0 }
  0xfc   :  { %v233_v50 = vmax.f32 %v143_v44, %v217_v47  ;;  %v153_v51 = vadd.f32 %v4298_v49, %v6874_v42  ;;  %v147_v52 = vpop.f32.mrb[3].mxu0 }
  0xfd   :  { %v232_v53 = vmax.f32 %v138_v46, %v216_v48  ;;  %v148_v54 = vadd.f32 %v6874_v42, %v147_v52  ;;  %v249_v52 = vld [vmem:[%s8268_s3 + $0x8] sm:$0xff] }
  0xfe   :  { %v219_v55 = vmul.f32 0.2, %v153_v51 }
  0xff   :  { %v6880_v56 = vpack.c.bf16 %v233_v50, %v232_v53  ;;  %v218_v57 = vmul.f32 0.2, %v148_v54  ;;  %v4301_v58 = vpop.f32.mrb[4].mxu0  ;;  %v3508_v53 = vld [vmem:[%s8268_s3 + $0x30] sm:$0xff] }
 0x100   :  { %v235_v59 = vmax.f32 %v153_v51, %v219_v55  ;;  %v163_v60 = vadd.f32 %v4301_v58, %v6874_v42  ;;  %v157_v61 = vpop.f32.mrb[5].mxu0  ;;  %v3507_v51 = vld [vmem:[%s8268_s3 + $0x28] sm:$0xff]  ;;  %v3509_v55 = vld [vmem:[%s8268_s3 + $0x38] sm:$0xff]  ;;  %v3510_v58 = vld [vmem:[%s8268_s3 + $0x40] sm:$0xff] }
 0x101   :  { %v234_v62 = vmax.f32 %v148_v54, %v218_v57  ;;  %v158_v63 = vadd.f32 %v6874_v42, %v157_v61  ;;  %5604 = vmatprep.subr.bf16.mxu1 %v6880_v56  ;;  %5636 = vmatprep.subr.bf16.mxu0 %v6880_v56  ;;  %v250_v54 = vld [vmem:[%s8268_s3 + $0x10] sm:$0xff]  ;;  %v251_v57 = vld [vmem:[%s8268_s3 + $0x18] sm:$0xff] }
 0x102   :  { %v221_v0 = vmul.f32 0.2, %v163_v60  ;;  %5606 = vmatpush3.bf16.msra.mxu1 %v6880_v56  ;;  %5638 = vmatpush3.bf16.msra.mxu0 %v6880_v56  ;;  %v3513_v61 = vld [vmem:[%s8268_s3 + $0x58] sm:$0xff] }
 0x103   :  { %v6888_v1 = vpack.c.bf16 %v235_v59, %v234_v62  ;;  %v220_v2 = vmul.f32 0.2, %v158_v63  ;;  %v4304_v3 = vpop.f32.mrb[6].mxu0  ;;  %v3511_v59 = vld [vmem:[%s8268_s3 + $0x48] sm:$0xff]  ;;  %v3514_v62 = vld [vmem:[%s8268_s3 + $0x60] sm:$0xff] }
 0x104   :  { %v237_v4 = vmax.f32 %v163_v60, %v221_v0  ;;  %v173_v5 = vadd.f32 %v4304_v3, %v6874_v42  ;;  %v167_v6 = vpop.f32.mrb[7].mxu0  ;;  %v3512_v60 = vld [vmem:[%s8268_s3 + $0x50] sm:$0xff]  ;;  %v444_v0 = vld [vmem:[%s8270_s4 + $0x88] sm:$0xff] }
 0x105   :  { %v236_v7 = vmax.f32 %v158_v63, %v220_v2  ;;  %v168_v8 = vadd.f32 %v6874_v42, %v167_v6  ;;  %5608 = vmatprep.subr.bf16.mxu1 %v6888_v1  ;;  %5640 = vmatprep.subr.bf16.mxu0 %v6888_v1  ;;  %v443_v63 = vld [vmem:[%s8270_s4 + $0x8] sm:$0xff] }
 0x106   :  { %v223_v9 = vmul.f32 0.2, %v173_v5  ;;  %5610 = vmatpush3.bf16.msra.mxu1 %v6888_v1  ;;  %5642 = vmatpush3.bf16.msra.mxu0 %v6888_v1  ;;  %v5667_v2 = vpack.c.bf16 %v444_v0, %v443_v63  ;;  %v445_v3 = vld [vmem:[%s8270_s4 + $0x108] sm:$0xff] }
 0x107   :  { %v6896_v10 = vpack.c.bf16 %v237_v4, %v236_v7  ;;  %v222_v11 = vmul.f32 0.2, %v168_v8  ;;  %v4307_v12 = vpop.f32.mrb[8].mxu0  ;;  %v446_v4 = vld [vmem:[%s8270_s4 + $0x188] sm:$0xff] }
 0x108   :  { %v239_v13 = vmax.f32 %v173_v5, %v223_v9  ;;  %v183_v14 = vadd.f32 %v4307_v12, %v6874_v42  ;;  %v177_v15 = vpop.f32.mrb[9].mxu0  ;;  %v5671_v5 = vpack.c.bf16 %v446_v4, %v445_v3  ;;  %v447_v6 = vld [vmem:[%s8270_s4 + $0x208] sm:$0xff] }
 0x109   :  { %v238_v16 = vmax.f32 %v168_v8, %v222_v11  ;;  %v178_v17 = vadd.f32 %v6874_v42, %v177_v15  ;;  %5612 = vmatprep.subr.bf16.mxu1 %v6896_v10  ;;  %5644 = vmatprep.subr.bf16.mxu0 %v6896_v10  ;;  %v448_v7 = vld [vmem:[%s8270_s4 + $0x288] sm:$0xff]  ;;  %v3516_v11 = vld [vmem:[%s8268_s3 + $0x70] sm:$0xff]  ;;  %v3517_v15 = vld [vmem:[%s8268_s3 + $0x78] sm:$0xff] }
 0x10a   :  { %v225_v18 = vmul.f32 0.2, %v183_v14  ;;  %5614 = vmatpush3.bf16.msra.mxu1 %v6896_v10  ;;  %5646 = vmatpush3.bf16.msra.mxu0 %v6896_v10  ;;  %v5675_v8 = vpack.c.bf16 %v448_v7, %v447_v6  ;;  %v3515_v9 = vld [vmem:[%s8268_s3 + $0x68] sm:$0xff]  ;;  %v344_v6 = vld [vmem:[%s8270_s4 + $0x380] sm:$0xff] }
 0x10b   :  { %v6904_v19 = vpack.c.bf16 %v239_v13, %v238_v16  ;;  %v224_v20 = vmul.f32 0.2, %v178_v17  ;;  %v4310_v21 = vpop.f32.mrb[10].mxu0  ;;  %v449_v12 = vld [vmem:[%s8270_s4 + $0x308] sm:$0xff]  ;;  %v3518_v16 = vld [vmem:[%s8268_s3 + $0x80] sm:$0xff] }
 0x10c   :  { %v241_v22 = vmax.f32 %v183_v14, %v225_v18  ;;  %v193_v23 = vadd.f32 %v4310_v21, %v6874_v42  ;;  %v187_v24 = vpop.f32.mrb[11].mxu0  ;;  %v450_v13 = vld [vmem:[%s8270_s4 + $0x388] sm:$0xff] }
 0x10d   :  { %v240_v25 = vmax.f32 %v178_v17, %v224_v20  ;;  %v188_v26 = vadd.f32 %v6874_v42, %v187_v24  ;;  %5616 = vmatprep.subr.bf16.mxu1 %v6904_v19  ;;  %5648 = vmatprep.subr.bf16.mxu0 %v6904_v19  ;;  %v5679_v14 = vpack.c.bf16 %v450_v13, %v449_v12  ;;  %v451_v17 = vld [vmem:[%s8270_s4 + $0x408] sm:$0xff]  ;;  %v3536_v12 = vld [vmem:[%s8268_s3 + $0x110] sm:$0xff] }
 0x10e   :  { %v227_v27 = vmul.f32 0.2, %v193_v23  ;;  %5618 = vmatpush3.bf16.msra.mxu1 %v6904_v19  ;;  %5650 = vmatpush3.bf16.msra.mxu0 %v6904_v19  ;;  %v452_v18 = vld [vmem:[%s8270_s4 + $0x488] sm:$0xff] }
 0x10f   :  { %v6912_v28 = vpack.c.bf16 %v241_v22, %v240_v25  ;;  %v226_v29 = vmul.f32 0.2, %v188_v26  ;;  %v4313_v30 = vpop.f32.mrb[12].mxu0  ;;  %v5683_v20 = vpack.c.bf16 %v452_v18, %v451_v17  ;;  %v453_v21 = vld [vmem:[%s8270_s4 + $0x508] sm:$0xff]  ;;  %v3538_v17 = vld [vmem:[%s8268_s3 + $0x120] sm:$0xff] }
 0x110   :  { %v243_v31 = vmax.f32 %v193_v23, %v227_v27  ;;  %v203_v32 = vadd.f32 %v4313_v30, %v6874_v42  ;;  %v197_v33 = vpop.f32.mrb[13].mxu0  ;;  %v454_v22 = vld [vmem:[%s8270_s4 + $0x588] sm:$0xff] }
 0x111   :  { %v242_v34 = vmax.f32 %v188_v26, %v226_v29  ;;  %v198_v35 = vadd.f32 %v6874_v42, %v197_v33  ;;  %5620 = vmatprep.subr.bf16.mxu1 %v6912_v28  ;;  %5652 = vmatprep.subr.bf16.mxu0 %v6912_v28  ;;  %v5687_v23 = vpack.c.bf16 %v454_v22, %v453_v21  ;;  %v455_v24 = vld [vmem:[%s8270_s4 + $0x608] sm:$0xff]  ;;  %v350_v21 = vld [vmem:[%s8270_s4 + $0x680] sm:$0xff] }
 0x112   :  { %v229_v36 = vmul.f32 0.2, %v203_v32  ;;  %5622 = vmatpush3.bf16.msra.mxu1 %v6912_v28  ;;  %5654 = vmatpush3.bf16.msra.mxu0 %v6912_v28  ;;  %v456_v25 = vld [vmem:[%s8270_s4 + $0x688] sm:$0xff] }
 0x113   :  { %v6920_v37 = vpack.c.bf16 %v243_v31, %v242_v34  ;;  %v228_v38 = vmul.f32 0.2, %v198_v35  ;;  %v4316_v39 = vpop.f32.mrb[14].mxu0  ;;  %v5691_v26 = vpack.c.bf16 %v456_v25, %v455_v24  ;;  %v457_v27 = vld [vmem:[%s8270_s4 + $0x708] sm:$0xff]  ;;  %v337_v31 = vld [vmem:[%s8270_s4] sm:$0xff] }
 0x114   :  { %v245_v40 = vmax.f32 %v203_v32, %v229_v36  ;;  %v213_v41 = vadd.f32 %v4316_v39, %v6874_v42  ;;  %v207_v43 = vpop.f32.mrb[15].mxu0  ;;  %v458_v29 = vld [vmem:[%s8270_s4 + $0x788] sm:$0xff]  ;;  %v338_v32 = vld [vmem:[%s8270_s4 + $0x80] sm:$0xff]  ;;  %v3521_v36 = vld [vmem:[%s8268_s3 + $0x98] sm:$0xff] }
 0x115   :  { %v244_v44 = vmax.f32 %v198_v35, %v228_v38  ;;  %v208_v45 = vadd.f32 %v6874_v42, %v207_v43  ;;  %5624 = vmatprep.subr.bf16.mxu1 %v6920_v37  ;;  %5656 = vmatprep.subr.bf16.mxu0 %v6920_v37  ;;  %v5695_v30 = vpack.c.bf16 %v458_v29, %v457_v27  ;;  %v3519_v34 = vld [vmem:[%s8268_s3 + $0x88] sm:$0xff]  ;;  %v3520_v35 = vld [vmem:[%s8268_s3 + $0x90] sm:$0xff]  ;;  %v3522_v38 = vld [vmem:[%s8268_s3 + $0xa0] sm:$0xff] }
 0x116   :  { %v231_v46 = vmul.f32 0.2, %v213_v41  ;;  %5626 = vmatpush3.bf16.msra.mxu1 %v6920_v37  ;;  %5658 = vmatpush3.bf16.msra.mxu0 %v6920_v37  ;;  %v7082_v33 = vpack.c.bf16 %v338_v32, %v337_v31  ;;  %v3523_v39 = vld [vmem:[%s8268_s3 + $0xa8] sm:$0xff]  ;;  %v3526_v43 = vld [vmem:[%s8268_s3 + $0xc0] sm:$0xff]  ;;  %v720_v27 = vld [vmem:[%s8270_s4 + $0x90] sm:$0xff] }
 0x117   :  { %v6928_v47 = vpack.c.bf16 %v245_v40, %v244_v44  ;;  %v230_v48 = vmul.f32 0.2, %v208_v45  ;;  %v3524_v40 = vld [vmem:[%s8268_s3 + $0xb0] sm:$0xff]  ;;  %v3527_v44 = vld [vmem:[%s8268_s3 + $0xc8] sm:$0xff]  ;;  %v352_v24 = vld [vmem:[%s8270_s4 + $0x780] sm:$0xff] }
 0x118   :  { %v247_v49 = vmax.f32 %v213_v41, %v231_v46  ;;  %v3525_v41 = vld [vmem:[%s8268_s3 + $0xb8] sm:$0xff]  ;;  %v722_v31 = vld [vmem:[%s8270_s4 + $0x190] sm:$0xff] }
 0x119   :  { %v246_v50 = vmax.f32 %v208_v45, %v230_v48  ;;  %5628 = vmatprep.subr.bf16.mxu1 %v6928_v47  ;;  %5660 = vmatprep.subr.bf16.mxu0 %v6928_v47  ;;  %v3528_v45 = vld [vmem:[%s8268_s3 + $0xd0] sm:$0xff]  ;;  %v3529_v46 = vld [vmem:[%s8268_s3 + $0xd8] sm:$0xff]  ;;  %v3530_v48 = vld [vmem:[%s8268_s3 + $0xe0] sm:$0xff] }
 0x11a   :  { %5630 = vmatpush3.bf16.msra.mxu1 %v6928_v47  ;;  %5662 = vmatpush3.bf16.msra.mxu0 %v6928_v47 }
 0x11b   :  { %v6934_v42 = vpack.c.bf16 %v247_v49, %v246_v50  ;;  %v3531_v49 = vld [vmem:[%s8268_s3 + $0xe8] sm:$0xff]  ;;  %v3532_v50 = vld [vmem:[%s8268_s3 + $0xf0] sm:$0xff] }
 0x11d   :  { %5632 = vmatprep.subr.bf16.mxu1 %v6934_v42  ;;  %5664 = vmatprep.subr.bf16.mxu0 %v6934_v42 }
 0x11e   :  { %5634 = vmatpush3.bf16.msra.mxu1 %v6934_v42  ;;  %5666 = vmatpush3.bf16.msra.mxu0 %v6934_v42 }
 0x11f   :  { %5732 = vmatprep.subr.bf16.mxu0 %v6880_v56  ;;  %5668 = vmatprep.subr.bf16.mxu1 %v5667_v2 }
 0x121   :  { %4388 = vmatmul.mubr.f32.vlgmr.msra.gmra.mrb[16].mxu0 %v3507_v51  ;;  %4350 = vmatmul.mubr.f32.vlgmr.msra.gmra.mrb[0].mxu1 %v249_v52  ;;  %v3533_v51 = vld [vmem:[%s8268_s3 + $0xf8] sm:$0xff]  ;;  %v3534_v52 = vld [vmem:[%s8268_s3 + $0x100] sm:$0xff] }
 0x122   :  { %5734 = vmatpush3.bf16.msra.mxu0 %v6880_v56  ;;  %4390 = vmatprep.mubr.f32.mxu0 %v3508_v53  ;;  %v339_v53 = vld [vmem:[%s8270_s4 + $0x100] sm:$0xff] }
 0x123   :  { %5736 = vmatprep.subr.bf16.mxu0 %v6888_v1  ;;  %4352 = vmatprep.mubr.f32.mxu1 %v250_v54  ;;  %v340_v54 = vld [vmem:[%s8270_s4 + $0x180] sm:$0xff] }
 0x124   :  { %5670 = vmatpush3.bf16.msra.mxu1 %v5667_v2 }
 0x125   :  { %4391 = vmatmul.mubr.f32.gmra.mrb[18].mxu0 %v3509_v55  ;;  %4353 = vmatmul.mubr.f32.gmra.mrb[2].mxu1 %v251_v57 }
 0x126   :  { %5738 = vmatpush3.bf16.msra.mxu0 %v6888_v1  ;;  %4501 = vmatprep.mubr.f32.mxu0 %v3510_v58 }
 0x127   :  { %5740 = vmatprep.subr.bf16.mxu0 %v6896_v10  ;;  %5672 = vmatprep.subr.bf16.mxu1 %v5671_v5 }
 0x128   :  { %5674 = vmatpush3.bf16.msra.mxu1 %v5671_v5  ;;  %v343_v5 = vld [vmem:[%s8270_s4 + $0x300] sm:$0xff] }
 0x129   :  { %5676 = vmatprep.subr.bf16.mxu1 %v5675_v8  ;;  %v5711_v7 = vpack.c.bf16 %v344_v6, %v343_v5 }
 0x12a   :  { %5742 = vmatpush3.bf16.msra.mxu0 %v6896_v10 }
 0x12b   :  { %5744 = vmatprep.subr.bf16.mxu0 %v6904_v19 }
 0x12c   :  { %5678 = vmatpush3.bf16.msra.mxu1 %v5675_v8  ;;  %v3535_v8 = vld [vmem:[%s8268_s3 + $0x108] sm:$0xff] }
 0x12d   :  { %5680 = vmatprep.subr.bf16.mxu1 %v5679_v14 }
 0x12e   :  { %5746 = vmatpush3.bf16.msra.mxu0 %v6904_v19 }
 0x12f   :  { %5748 = vmatprep.subr.bf16.mxu0 %v6912_v28 }
 0x130   :  { %5682 = vmatpush3.bf16.msra.mxu1 %v5679_v14  ;;  %v347_v14 = vld [vmem:[%s8270_s4 + $0x500] sm:$0xff] }
 0x131   :  { %5684 = vmatprep.subr.bf16.mxu1 %v5683_v20 }
 0x132   :  { %5750 = vmatpush3.bf16.msra.mxu0 %v6912_v28 }
 0x133   :  { %5752 = vmatprep.subr.bf16.mxu0 %v6920_v37 }
 0x134   :  { %5686 = vmatpush3.bf16.msra.mxu1 %v5683_v20  ;;  %v349_v20 = vld [vmem:[%s8270_s4 + $0x600] sm:$0xff] }
 0x135   :  { %5688 = vmatprep.subr.bf16.mxu1 %v5687_v23  ;;  %v5723_v22 = vpack.c.bf16 %v350_v21, %v349_v20  ;;  %v923_v20 = vld [vmem:[%s8270_s4 + $0x498] sm:$0xff]  ;;  %v3544_v21 = vld [vmem:[%s8268_s3 + $0x150] sm:$0xff] }
 0x136   :  { %5754 = vmatpush3.bf16.msra.mxu0 %v6920_v37 }
 0x137   :  { %5756 = vmatprep.subr.bf16.mxu0 %v6928_v47 }
 0x138   :  { %5690 = vmatpush3.bf16.msra.mxu1 %v5687_v23  ;;  %v351_v23 = vld [vmem:[%s8270_s4 + $0x700] sm:$0xff] }
 0x139   :  { %5692 = vmatprep.subr.bf16.mxu1 %v5691_v26  ;;  %v5727_v25 = vpack.c.bf16 %v352_v24, %v351_v23  ;;  %v924_v23 = vld [vmem:[%s8270_s4 + $0x518] sm:$0xff] }
 0x13a   :  { %5758 = vmatpush3.bf16.msra.mxu0 %v6928_v47  ;;  %v925_v24 = vld [vmem:[%s8270_s4 + $0x598] sm:$0xff] }
 0x13b   :  { %5760 = vmatprep.subr.bf16.mxu0 %v6934_v42 }
 0x13c   :  { %5694 = vmatpush3.bf16.msra.mxu1 %v5691_v26  ;;  %v719_v26 = vld [vmem:[%s8270_s4 + $0x10] sm:$0xff] }
 0x13d   :  { %5696 = vmatprep.subr.bf16.mxu1 %v5695_v30  ;;  %v5763_v29 = vpack.c.bf16 %v720_v27, %v719_v26  ;;  %v3546_v26 = vld [vmem:[%s8268_s3 + $0x160] sm:$0xff]  ;;  %v5847_v27 = vpack.c.bf16 %v925_v24, %v924_v23  ;;  %v1310_v23 = vld [vmem:[%s8270_s4 + $0x328] sm:$0xff] }
 0x13e   :  { %5762 = vmatpush3.bf16.msra.mxu0 %v6934_v42  ;;  %v1311_v24 = vld [vmem:[%s8270_s4 + $0x3a8] sm:$0xff] }
 0x13f   :  { %5796 = vmatprep.subr.bf16.mxu0 %v6880_v56 }
 0x140   :  { %5698 = vmatpush3.bf16.msra.mxu1 %v5695_v30  ;;  %v721_v30 = vld [vmem:[%s8270_s4 + $0x110] sm:$0xff] }
 0x141   :  { %4502 = vmatmul.mubr.f32.vlgmr.msra.gmra.mrb[20].mxu0 %v3511_v59  ;;  %5700 = vmatprep.subr.bf16.mxu1 %v7082_v33  ;;  %v5703_v59 = vpack.c.bf16 %v340_v54, %v339_v53  ;;  %v3541_v53 = vld [vmem:[%s8268_s3 + $0x138] sm:$0xff]  ;;  %v3542_v54 = vld [vmem:[%s8268_s3 + $0x140] sm:$0xff] }
 0x142   :  { %5798 = vmatpush3.bf16.msra.mxu0 %v6880_v56  ;;  %4504 = vmatprep.mubr.f32.mxu0 %v3512_v60 }
 0x143   :  { %5800 = vmatprep.subr.bf16.mxu0 %v6888_v1 }
 0x145   :  { %4505 = vmatmul.mubr.f32.gmra.mrb[22].mxu0 %v3513_v61  ;;  %v341_v61 = vld [vmem:[%s8270_s4 + $0x200] sm:$0xff] }
 0x146   :  { %5802 = vmatpush3.bf16.msra.mxu0 %v6888_v1  ;;  %4577 = vmatprep.mubr.f32.mxu0 %v3514_v62  ;;  %v342_v62 = vld [vmem:[%s8270_s4 + $0x280] sm:$0xff] }
 0x147   :  { %5804 = vmatprep.subr.bf16.mxu0 %v6896_v10  ;;  %v5707_v2 = vpack.c.bf16 %v342_v62, %v341_v61  ;;  %v734_v61 = vld [vmem:[%s8270_s4 + $0x790] sm:$0xff] }
 0x14a   :  { %5806 = vmatpush3.bf16.msra.mxu0 %v6896_v10 }
 0x14b   :  { %5808 = vmatprep.subr.bf16.mxu0 %v6904_v19 }
 0x14e   :  { %5810 = vmatpush3.bf16.msra.mxu0 %v6904_v19 }
 0x14f   :  { %5812 = vmatprep.subr.bf16.mxu0 %v6912_v28 }
 0x152   :  { %5814 = vmatpush3.bf16.msra.mxu0 %v6912_v28 }
 0x153   :  { %5816 = vmatprep.subr.bf16.mxu0 %v6920_v37 }
 0x156   :  { %5818 = vmatpush3.bf16.msra.mxu0 %v6920_v37 }
 0x157   :  { %5820 = vmatprep.subr.bf16.mxu0 %v6928_v47 }
 0x15a   :  { %5822 = vmatpush3.bf16.msra.mxu0 %v6928_v47 }
 0x15b   :  { %5824 = vmatprep.subr.bf16.mxu0 %v6934_v42 }
 0x15e   :  { %5826 = vmatpush3.bf16.msra.mxu0 %v6934_v42 }
 0x15f   :  { %5860 = vmatprep.subr.bf16.mxu0 %v6880_v56 }
 0x161   :  { %4578 = vmatmul.mubr.f32.vlgmr.msra.gmra.mrb[24].mxu0 %v3515_v9  ;;  %v345_v9 = vld [vmem:[%s8270_s4 + $0x400] sm:$0xff] }
 0x162   :  { %5862 = vmatpush3.bf16.msra.mxu0 %v6880_v56  ;;  %4580 = vmatprep.mubr.f32.mxu0 %v3516_v11  ;;  %v346_v11 = vld [vmem:[%s8270_s4 + $0x480] sm:$0xff] }
 0x163   :  { %5864 = vmatprep.subr.bf16.mxu0 %v6888_v1  ;;  %v5715_v13 = vpack.c.bf16 %v346_v11, %v345_v9  ;;  %v919_v9 = vld [vmem:[%s8270_s4 + $0x298] sm:$0xff] }
 0x165   :  { %4581 = vmatmul.mubr.f32.gmra.mrb[26].mxu0 %v3517_v15  ;;  %v348_v15 = vld [vmem:[%s8270_s4 + $0x580] sm:$0xff] }
 0x166   :  { %5866 = vmatpush3.bf16.msra.mxu0 %v6888_v1  ;;  %4653 = vmatprep.mubr.f32.mxu0 %v3518_v16  ;;  %v3537_v16 = vld [vmem:[%s8268_s3 + $0x118] sm:$0xff]  ;;  %v5719_v18 = vpack.c.bf16 %v348_v15, %v347_v14 }
 0x167   :  { %5868 = vmatprep.subr.bf16.mxu0 %v6896_v10  ;;  %v920_v14 = vld [vmem:[%s8270_s4 + $0x318] sm:$0xff] }
 0x168   :  { %v921_v15 = vld [vmem:[%s8270_s4 + $0x398] sm:$0xff] }
 0x16a   :  { %5870 = vmatpush3.bf16.msra.mxu0 %v6896_v10 }
 0x16b   :  { %5872 = vmatprep.subr.bf16.mxu0 %v6904_v19 }
 0x16e   :  { %5874 = vmatpush3.bf16.msra.mxu0 %v6904_v19 }
 0x16f   :  { %5876 = vmatprep.subr.bf16.mxu0 %v6912_v28 }
 0x172   :  { %5878 = vmatpush3.bf16.msra.mxu0 %v6912_v28 }
 0x173   :  { %5880 = vmatprep.subr.bf16.mxu0 %v6920_v37 }
 0x176   :  { %5882 = vmatpush3.bf16.msra.mxu0 %v6920_v37 }
 0x177   :  { %5884 = vmatprep.subr.bf16.mxu0 %v6928_v47 }
 0x17a   :  { %5886 = vmatpush3.bf16.msra.mxu0 %v6928_v47 }
 0x17b   :  { %5888 = vmatprep.subr.bf16.mxu0 %v6934_v42 }
 0x17e   :  { %5890 = vmatpush3.bf16.msra.mxu0 %v6934_v42 }
 0x17f   :  { %5924 = vmatprep.subr.bf16.mxu0 %v6880_v56 }
 0x181   :  { %4654 = vmatmul.mubr.f32.vlgmr.msra.gmra.mrb[28].mxu0 %v3519_v34 }
 0x182   :  { %5926 = vmatpush3.bf16.msra.mxu0 %v6880_v56  ;;  %4656 = vmatprep.mubr.f32.mxu0 %v3520_v35  ;;  %v723_v35 = vld [vmem:[%s8270_s4 + $0x210] sm:$0xff] }
 0x183   :  { %5928 = vmatprep.subr.bf16.mxu0 %v6888_v1 }
 0x185   :  { %4657 = vmatmul.mubr.f32.gmra.mrb[30].mxu0 %v3521_v36  ;;  %v724_v36 = vld [vmem:[%s8270_s4 + $0x290] sm:$0xff] }
 0x186   :  { %5930 = vmatpush3.bf16.msra.mxu0 %v6888_v1  ;;  %4729 = vmatprep.mubr.f32.mxu0 %v3522_v38 }
 0x187   :  { %5932 = vmatprep.subr.bf16.mxu0 %v6896_v10 }
 0x18a   :  { %5934 = vmatpush3.bf16.msra.mxu0 %v6896_v10 }
 0x18b   :  { %5936 = vmatprep.subr.bf16.mxu0 %v6904_v19 }
 0x18e   :  { %5938 = vmatpush3.bf16.msra.mxu0 %v6904_v19 }
 0x18f   :  { %5940 = vmatprep.subr.bf16.mxu0 %v6912_v28 }
 0x192   :  { %5942 = vmatpush3.bf16.msra.mxu0 %v6912_v28 }
 0x193   :  { %5944 = vmatprep.subr.bf16.mxu0 %v6920_v37 }
 0x196   :  { %5946 = vmatpush3.bf16.msra.mxu0 %v6920_v37 }
 0x197   :  { %5948 = vmatprep.subr.bf16.mxu0 %v6928_v47 }
 0x19a   :  { %5950 = vmatpush3.bf16.msra.mxu0 %v6928_v47 }
 0x19b   :  { %5952 = vmatprep.subr.bf16.mxu0 %v6934_v42 }
 0x19e   :  { %5954 = vmatpush3.bf16.msra.mxu0 %v6934_v42 }
 0x19f   :  { %5988 = vmatprep.subr.bf16.mxu0 %v6880_v56 }
 0x1a1   :  { %4730 = vmatmul.mubr.f32.vlgmr.msra.gmra.mrb[32].mxu0 %v3523_v39  ;;  %v5771_v39 = vpack.c.bf16 %v724_v36, %v723_v35  ;;  %v1109_v35 = vld [vmem:[%s8270_s4 + $0x20] sm:$0xff] }
 0x1a2   :  { %5990 = vmatpush3.bf16.msra.mxu0 %v6880_v56  ;;  %4732 = vmatprep.mubr.f32.mxu0 %v3524_v40  ;;  %v1110_v36 = vld [vmem:[%s8270_s4 + $0xa0] sm:$0xff] }
 0x1a3   :  { %5992 = vmatprep.subr.bf16.mxu0 %v6888_v1 }
 0x1a5   :  { %4733 = vmatmul.mubr.f32.gmra.mrb[34].mxu0 %v3525_v41  ;;  %v725_v41 = vld [vmem:[%s8270_s4 + $0x310] sm:$0xff] }
 0x1a6   :  { %5994 = vmatpush3.bf16.msra.mxu0 %v6888_v1  ;;  %4805 = vmatprep.mubr.f32.mxu0 %v3526_v43  ;;  %v726_v43 = vld [vmem:[%s8270_s4 + $0x390] sm:$0xff] }
 0x1a7   :  { %5996 = vmatprep.subr.bf16.mxu0 %v6896_v10 }
 0x1aa   :  { %5998 = vmatpush3.bf16.msra.mxu0 %v6896_v10 }
 0x1ab   :  { %6000 = vmatprep.subr.bf16.mxu0 %v6904_v19 }
 0x1ae   :  { %6002 = vmatpush3.bf16.msra.mxu0 %v6904_v19 }
 0x1af   :  { %6004 = vmatprep.subr.bf16.mxu0 %v6912_v28 }
 0x1b2   :  { %6006 = vmatpush3.bf16.msra.mxu0 %v6912_v28 }
 0x1b3   :  { %6008 = vmatprep.subr.bf16.mxu0 %v6920_v37 }
 0x1b6   :  { %6010 = vmatpush3.bf16.msra.mxu0 %v6920_v37 }
 0x1b7   :  { %6012 = vmatprep.subr.bf16.mxu0 %v6928_v47 }
 0x1ba   :  { %6014 = vmatpush3.bf16.msra.mxu0 %v6928_v47 }
 0x1bb   :  { %6016 = vmatprep.subr.bf16.mxu0 %v6934_v42 }
 0x1be   :  { %6018 = vmatpush3.bf16.msra.mxu0 %v6934_v42 }
 0x1bf   :  { %6052 = vmatprep.subr.bf16.mxu0 %v6880_v56 }
 0x1c1   :  { %4806 = vmatmul.mubr.f32.vlgmr.msra.gmra.mrb[36].mxu0 %v3527_v44  ;;  %v5775_v44 = vpack.c.bf16 %v726_v43, %v725_v41 }
 0x1c2   :  { %6054 = vmatpush3.bf16.msra.mxu0 %v6880_v56  ;;  %4808 = vmatprep.mubr.f32.mxu0 %v3528_v45  ;;  %v3539_v45 = vld [vmem:[%s8268_s3 + $0x128] sm:$0xff] }
 0x1c3   :  { %6056 = vmatprep.subr.bf16.mxu0 %v6888_v1 }
 0x1c5   :  { %4809 = vmatmul.mubr.f32.gmra.mrb[38].mxu0 %v3529_v46  ;;  %v727_v46 = vld [vmem:[%s8270_s4 + $0x410] sm:$0xff] }
 0x1c6   :  { %6058 = vmatpush3.bf16.msra.mxu0 %v6888_v1  ;;  %4881 = vmatprep.mubr.f32.mxu0 %v3530_v48  ;;  %v728_v48 = vld [vmem:[%s8270_s4 + $0x490] sm:$0xff] }
 0x1c7   :  { %6060 = vmatprep.subr.bf16.mxu0 %v6896_v10 }
 0x1ca   :  { %6062 = vmatpush3.bf16.msra.mxu0 %v6896_v10 }
 0x1cb   :  { %6064 = vmatprep.subr.bf16.mxu0 %v6904_v19 }
 0x1ce   :  { %6066 = vmatpush3.bf16.msra.mxu0 %v6904_v19 }
 0x1cf   :  { %6068 = vmatprep.subr.bf16.mxu0 %v6912_v28 }
 0x1d2   :  { %6070 = vmatpush3.bf16.msra.mxu0 %v6912_v28 }
 0x1d3   :  { %6072 = vmatprep.subr.bf16.mxu0 %v6920_v37 }
 0x1d6   :  { %6074 = vmatpush3.bf16.msra.mxu0 %v6920_v37 }
 0x1d7   :  { %6076 = vmatprep.subr.bf16.mxu0 %v6928_v47 }
 0x1da   :  { %6078 = vmatpush3.bf16.msra.mxu0 %v6928_v47 }
 0x1db   :  { %6080 = vmatprep.subr.bf16.mxu0 %v6934_v42 }
 0x1de   :  { %6082 = vmatpush3.bf16.msra.mxu0 %v6934_v42 }
 0x1df   :  { %6116 = vmatprep.subr.bf16.mxu0 %v6880_v56 }
 0x1e1   :  { %4882 = vmatmul.mubr.f32.vlgmr.msra.gmra.mrb[40].mxu0 %v3531_v49  ;;  %v3540_v49 = vld [vmem:[%s8268_s3 + $0x130] sm:$0xff] }
 0x1e2   :  { %6118 = vmatpush3.bf16.msra.mxu0 %v6880_v56  ;;  %4884 = vmatprep.mubr.f32.mxu0 %v3532_v50  ;;  %v5779_v50 = vpack.c.bf16 %v728_v48, %v727_v46  ;;  %v1114_v46 = vld [vmem:[%s8270_s4 + $0x2a0] sm:$0xff] }
 0x1e3   :  { %6120 = vmatprep.subr.bf16.mxu0 %v6888_v1 }
 0x1e5   :  { %4885 = vmatmul.mubr.f32.gmra.mrb[42].mxu0 %v3533_v51  ;;  %v729_v51 = vld [vmem:[%s8270_s4 + $0x510] sm:$0xff] }
 0x1e6   :  { %6122 = vmatpush3.bf16.msra.mxu0 %v6888_v1  ;;  %4957 = vmatprep.mubr.f32.mxu0 %v3534_v52  ;;  %v730_v52 = vld [vmem:[%s8270_s4 + $0x590] sm:$0xff] }
 0x1e7   :  { %6124 = vmatprep.subr.bf16.mxu0 %v6896_v10 }
 0x1ea   :  { %6126 = vmatpush3.bf16.msra.mxu0 %v6896_v10 }
 0x1eb   :  { %6128 = vmatprep.subr.bf16.mxu0 %v6904_v19 }
 0x1ee   :  { %6130 = vmatpush3.bf16.msra.mxu0 %v6904_v19 }
 0x1ef   :  { %6132 = vmatprep.subr.bf16.mxu0 %v6912_v28 }
 0x1f2   :  { %6134 = vmatpush3.bf16.msra.mxu0 %v6912_v28 }
 0x1f3   :  { %6136 = vmatprep.subr.bf16.mxu0 %v6920_v37 }
 0x1f4   :  { %v4389_v55 = vpop.f32.mrb[16].mxu0  ;;  %v7203_v57 = vpop.f32.mrb[0].mxu1 }
 0x1f5   :  { %v424_v58 = vpop.f32.mrb[17].mxu0  ;;  %v318_v60 = vpop.f32.mrb[1].mxu1 }
 0x1f6   :  { %4425 = vmatprep.mubr.f32.mxu1 %v424_v58  ;;  %6138 = vmatpush3.bf16.msra.mxu0 %v6920_v37  ;;  %v732_v58 = vld [vmem:[%s8270_s4 + $0x690] sm:$0xff] }
 0x1f7   :  { %4426 = vmatmul.mubr.f32.vlgmr.msra.gmra.mrb[4].mxu1 %v4389_v55  ;;  %6140 = vmatprep.subr.bf16.mxu0 %v6928_v47  ;;  %v5783_v55 = vpack.c.bf16 %v730_v52, %v729_v51  ;;  %v1115_v51 = vld [vmem:[%s8270_s4 + $0x320] sm:$0xff] }
 0x1f8   :  { %5702 = vmatpush3.bf16.msra.mxu1 %v7082_v33  ;;  %v4392_v63 = vpop.f32.mrb[18].mxu0  ;;  %v7214_v0 = vpop.f32.mrb[2].mxu1  ;;  %v5767_v33 = vpack.c.bf16 %v722_v31, %v721_v30  ;;  %v927_v30 = vld [vmem:[%s8270_s4 + $0x698] sm:$0xff]  ;;  %v1116_v52 = vld [vmem:[%s8270_s4 + $0x3a0] sm:$0xff] }
 0x1f9   :  { %5704 = vmatprep.subr.bf16.mxu1 %v5703_v59  ;;  %v434_v3 = vpop.f32.mrb[19].mxu0  ;;  %v7216_v4 = vpop.f32.mrb[3].mxu1 }
 0x1fa   :  { %6142 = vmatpush3.bf16.msra.mxu0 %v6928_v47  ;;  %4428 = vmatprep.mubr.f32.mxu1 %v434_v3  ;;  %v916_v3 = vld [vmem:[%s8270_s4 + $0x118] sm:$0xff] }
 0x1fb   :  { %6144 = vmatprep.subr.bf16.mxu0 %v6934_v42  ;;  %4429 = vmatmul.mubr.f32.gmra.mrb[6].mxu1 %v4392_v63  ;;  %v914_v63 = vld [vmem:[%s8270_s4 + $0x18] sm:$0xff] }
 0x1fc   :  { %5706 = vmatpush3.bf16.msra.mxu1 %v5703_v59  ;;  %4463 = vmatprep.mubr.f32.mxu1 %v318_v60  ;;  %v733_v60 = vld [vmem:[%s8270_s4 + $0x710] sm:$0xff] }
 0x1fd   :  { %5708 = vmatprep.subr.bf16.mxu1 %v5707_v2  ;;  %v5791_v62 = vpack.c.bf16 %v734_v61, %v733_v60  ;;  %v1119_v60 = vld [vmem:[%s8270_s4 + $0x520] sm:$0xff] }
 0x1fe   :  { %6146 = vmatpush3.bf16.msra.mxu0 %v6934_v42  ;;  %v1120_v61 = vld [vmem:[%s8270_s4 + $0x5a0] sm:$0xff] }
 0x1ff   :  { %6180 = vmatprep.subr.bf16.mxu0 %v6880_v56 }
 0x200   :  { %5710 = vmatpush3.bf16.msra.mxu1 %v5707_v2 }
 0x201   :  { %5712 = vmatprep.subr.bf16.mxu1 %v5711_v7  ;;  %4958 = vmatmul.mubr.f32.vlgmr.msra.gmra.mrb[44].mxu0 %v3535_v8  ;;  %v918_v8 = vld [vmem:[%s8270_s4 + $0x218] sm:$0xff] }
 0x202   :  { %6182 = vmatpush3.bf16.msra.mxu0 %v6880_v56  ;;  %4960 = vmatprep.mubr.f32.mxu0 %v3536_v12  ;;  %v5835_v12 = vpack.c.bf16 %v919_v9, %v918_v8  ;;  %v1304_v8 = vld [vmem:[%s8270_s4 + $0x28] sm:$0xff] }
 0x203   :  { %6184 = vmatprep.subr.bf16.mxu0 %v6888_v1  ;;  %v1305_v9 = vld [vmem:[%s8270_s4 + $0xa8] sm:$0xff] }
 0x204   :  { %5714 = vmatpush3.bf16.msra.mxu1 %v5711_v7 }
 0x205   :  { %5716 = vmatprep.subr.bf16.mxu1 %v5715_v13  ;;  %4961 = vmatmul.mubr.f32.gmra.mrb[46].mxu0 %v3537_v16  ;;  %v5839_v16 = vpack.c.bf16 %v921_v15, %v920_v14 }
 0x206   :  { %6186 = vmatpush3.bf16.msra.mxu0 %v6888_v1  ;;  %5033 = vmatprep.mubr.f32.mxu0 %v3538_v17  ;;  %v3543_v17 = vld [vmem:[%s8268_s3 + $0x148] sm:$0xff] }
 0x207   :  { %6188 = vmatprep.subr.bf16.mxu0 %v6896_v10 }
 0x208   :  { %5718 = vmatpush3.bf16.msra.mxu1 %v5715_v13 }
 0x209   :  { %5720 = vmatprep.subr.bf16.mxu1 %v5719_v18 }
 0x20a   :  { %6190 = vmatpush3.bf16.msra.mxu0 %v6896_v10 }
 0x20b   :  { %6192 = vmatprep.subr.bf16.mxu0 %v6904_v19 }
 0x20c   :  { %5722 = vmatpush3.bf16.msra.mxu1 %v5719_v18  ;;  %v922_v18 = vld [vmem:[%s8270_s4 + $0x418] sm:$0xff] }
 0x20d   :  { %5724 = vmatprep.subr.bf16.mxu1 %v5723_v22 }
 0x20e   :  { %6194 = vmatpush3.bf16.msra.mxu0 %v6904_v19 }
 0x20f   :  { %6196 = vmatprep.subr.bf16.mxu0 %v6912_v28 }
 0x210   :  { %5726 = vmatpush3.bf16.msra.mxu1 %v5723_v22  ;;  %v5843_v22 = vpack.c.bf16 %v923_v20, %v922_v18  ;;  %v1309_v18 = vld [vmem:[%s8270_s4 + $0x2a8] sm:$0xff] }
 0x211   :  { %5728 = vmatprep.subr.bf16.mxu1 %v5727_v25 }
 0x212   :  { %6198 = vmatpush3.bf16.msra.mxu0 %v6912_v28 }
 0x213   :  { %6200 = vmatprep.subr.bf16.mxu0 %v6920_v37 }
 0x214   :  { %5730 = vmatpush3.bf16.msra.mxu1 %v5727_v25  ;;  %v7286_v32 = vpop.f32.mrb[20].mxu0  ;;  %v3545_v25 = vld [vmem:[%s8268_s3 + $0x158] sm:$0xff] }
 0x215   :  { %5764 = vmatprep.subr.bf16.mxu1 %v5763_v29  ;;  %v700_v34 = vpop.f32.mrb[21].mxu0 }
 0x216   :  { %6202 = vmatpush3.bf16.msra.mxu0 %v6920_v37 }
 0x217   :  { %4464 = vmatmul.mubr.f32.vlgmr.msra.gmra.mrb[4].mxu1 %v7203_v57  ;;  %6204 = vmatprep.subr.bf16.mxu0 %v6928_v47  ;;  %v731_v57 = vld [vmem:[%s8270_s4 + $0x610] sm:$0xff] }
 0x218   :  { %5766 = vmatpush3.bf16.msra.mxu1 %v5763_v29  ;;  %4466 = vmatprep.mubr.f32.mxu1 %v7216_v4  ;;  %v7298_v38 = vpop.f32.mrb[22].mxu0  ;;  %v5787_v59 = vpack.c.bf16 %v732_v58, %v731_v57  ;;  %v917_v4 = vld [vmem:[%s8270_s4 + $0x198] sm:$0xff]  ;;  %v1118_v57 = vld [vmem:[%s8270_s4 + $0x4a0] sm:$0xff]  ;;  %v3548_v58 = vld [vmem:[%s8268_s3 + $0x170] sm:$0xff] }
 0x219   :  { %5768 = vmatprep.subr.bf16.mxu1 %v5767_v33  ;;  %v7300_v40 = vpop.f32.mrb[23].mxu0  ;;  %v5831_v6 = vpack.c.bf16 %v917_v4, %v916_v3  ;;  %v926_v29 = vld [vmem:[%s8270_s4 + $0x618] sm:$0xff]  ;;  %v1122_v3 = vld [vmem:[%s8270_s4 + $0x6a0] sm:$0xff] }
 0x21a   :  { %6206 = vmatpush3.bf16.msra.mxu0 %v6928_v47  ;;  %v5851_v31 = vpack.c.bf16 %v927_v30, %v926_v29  ;;  %v1313_v29 = vld [vmem:[%s8270_s4 + $0x4a8] sm:$0xff]  ;;  %v3552_v30 = vld [vmem:[%s8268_s3 + $0x190] sm:$0xff] }
 0x21b   :  { %6208 = vmatprep.subr.bf16.mxu0 %v6934_v42  ;;  %4467 = vmatmul.mubr.f32.gmra.mrb[6].mxu1 %v7214_v0  ;;  %v915_v0 = vld [vmem:[%s8270_s4 + $0x98] sm:$0xff] }
 0x21c   :  { %5770 = vmatpush3.bf16.msra.mxu1 %v5767_v33  ;;  %4539 = vmatprep.mubr.f32.mxu1 %v700_v34  ;;  %v5827_v2 = vpack.c.bf16 %v915_v0, %v914_v63  ;;  %v929_v33 = vld [vmem:[%s8270_s4 + $0x798] sm:$0xff]  ;;  %v3550_v63 = vld [vmem:[%s8268_s3 + $0x180] sm:$0xff]  ;;  %v5911_v0 = vpack.c.bf16 %v1120_v61, %v1119_v60  ;;  %v1505_v60 = vld [vmem:[%s8270_s4 + $0x330] sm:$0xff] }
 0x21d   :  { %5772 = vmatprep.subr.bf16.mxu1 %v5771_v39  ;;  %v1506_v61 = vld [vmem:[%s8270_s4 + $0x3b0] sm:$0xff] }
 0x21e   :  { %6210 = vmatpush3.bf16.msra.mxu0 %v6934_v42 }
 0x21f   :  { %6244 = vmatprep.subr.bf16.mxu0 %v6880_v56 }
 0x220   :  { %5774 = vmatpush3.bf16.msra.mxu1 %v5771_v39  ;;  %v1111_v39 = vld [vmem:[%s8270_s4 + $0x120] sm:$0xff] }
 0x221   :  { %5776 = vmatprep.subr.bf16.mxu1 %v5775_v44  ;;  %5034 = vmatmul.mubr.f32.vlgmr.msra.gmra.mrb[48].mxu0 %v3539_v45  ;;  %v1113_v45 = vld [vmem:[%s8270_s4 + $0x220] sm:$0xff] }
 0x222   :  { %6246 = vmatpush3.bf16.msra.mxu0 %v6880_v56  ;;  %5036 = vmatprep.mubr.f32.mxu0 %v3540_v49  ;;  %v5899_v49 = vpack.c.bf16 %v1114_v46, %v1113_v45  ;;  %v1499_v45 = vld [vmem:[%s8270_s4 + $0x30] sm:$0xff] }
 0x223   :  { %6248 = vmatprep.subr.bf16.mxu0 %v6888_v1  ;;  %v1500_v46 = vld [vmem:[%s8270_s4 + $0xb0] sm:$0xff] }
 0x224   :  { %5778 = vmatpush3.bf16.msra.mxu1 %v5775_v44 }
 0x225   :  { %5780 = vmatprep.subr.bf16.mxu1 %v5779_v50  ;;  %5037 = vmatmul.mubr.f32.gmra.mrb[50].mxu0 %v3541_v53  ;;  %v5903_v53 = vpack.c.bf16 %v1116_v52, %v1115_v51 }
 0x226   :  { %6250 = vmatpush3.bf16.msra.mxu0 %v6888_v1  ;;  %5109 = vmatprep.mubr.f32.mxu0 %v3542_v54  ;;  %v3547_v54 = vld [vmem:[%s8268_s3 + $0x168] sm:$0xff] }
 0x227   :  { %6252 = vmatprep.subr.bf16.mxu0 %v6896_v10 }
 0x228   :  { %5782 = vmatpush3.bf16.msra.mxu1 %v5779_v50 }
 0x229   :  { %5784 = vmatprep.subr.bf16.mxu1 %v5783_v55 }
 0x22a   :  { %6254 = vmatpush3.bf16.msra.mxu0 %v6896_v10 }
 0x22b   :  { %6256 = vmatprep.subr.bf16.mxu0 %v6904_v19 }
 0x22c   :  { %5786 = vmatpush3.bf16.msra.mxu1 %v5783_v55  ;;  %v1117_v55 = vld [vmem:[%s8270_s4 + $0x420] sm:$0xff] }
 0x22d   :  { %5788 = vmatprep.subr.bf16.mxu1 %v5787_v59 }
 0x22e   :  { %6258 = vmatpush3.bf16.msra.mxu0 %v6904_v19 }
 0x22f   :  { %6260 = vmatprep.subr.bf16.mxu0 %v6912_v28 }
 0x230   :  { %5790 = vmatpush3.bf16.msra.mxu1 %v5787_v59  ;;  %v5907_v59 = vpack.c.bf16 %v1118_v57, %v1117_v55  ;;  %v1504_v55 = vld [vmem:[%s8270_s4 + $0x2b0] sm:$0xff] }
 0x231   :  { %5792 = vmatprep.subr.bf16.mxu1 %v5791_v62 }
 0x232   :  { %6262 = vmatpush3.bf16.msra.mxu0 %v6912_v28 }
 0x233   :  { %6264 = vmatprep.subr.bf16.mxu0 %v6920_v37 }
 0x234   :  { %5794 = vmatpush3.bf16.msra.mxu1 %v5791_v62  ;;  %v7371_v5 = vpop.f32.mrb[24].mxu0  ;;  %v3549_v62 = vld [vmem:[%s8268_s3 + $0x178] sm:$0xff] }
 0x235   :  { %5828 = vmatprep.subr.bf16.mxu1 %v5827_v2  ;;  %v895_v7 = vpop.f32.mrb[25].mxu0 }
 0x236   :  { %6266 = vmatpush3.bf16.msra.mxu0 %v6920_v37 }
 0x237   :  { %4540 = vmatmul.mubr.f32.vlgmr.msra.gmra.mrb[4].mxu1 %v7286_v32  ;;  %6268 = vmatprep.subr.bf16.mxu0 %v6928_v47  ;;  %v928_v32 = vld [vmem:[%s8270_s4 + $0x718] sm:$0xff] }
 0x238   :  { %5830 = vmatpush3.bf16.msra.mxu1 %v5827_v2  ;;  %4542 = vmatprep.mubr.f32.mxu1 %v7300_v40  ;;  %v7383_v11 = vpop.f32.mrb[26].mxu0  ;;  %v5855_v34 = vpack.c.bf16 %v929_v33, %v928_v32  ;;  %v1112_v40 = vld [vmem:[%s8270_s4 + $0x1a0] sm:$0xff]  ;;  %v1314_v32 = vld [vmem:[%s8270_s4 + $0x528] sm:$0xff] }
 0x239   :  { %5832 = vmatprep.subr.bf16.mxu1 %v5831_v6  ;;  %v7385_v13 = vpop.f32.mrb[27].mxu0  ;;  %v5895_v43 = vpack.c.bf16 %v1112_v40, %v1111_v39  ;;  %v1121_v2 = vld [vmem:[%s8270_s4 + $0x620] sm:$0xff]  ;;  %v1315_v33 = vld [vmem:[%s8270_s4 + $0x5a8] sm:$0xff] }
 0x23a   :  { %6270 = vmatpush3.bf16.msra.mxu0 %v6928_v47  ;;  %v5915_v4 = vpack.c.bf16 %v1122_v3, %v1121_v2  ;;  %v1317_v39 = vld [vmem:[%s8270_s4 + $0x6a8] sm:$0xff]  ;;  %v1508_v2 = vld [vmem:[%s8270_s4 + $0x4b0] sm:$0xff] }
 0x23b   :  { %6272 = vmatprep.subr.bf16.mxu0 %v6934_v42  ;;  %4543 = vmatmul.mubr.f32.gmra.mrb[6].mxu1 %v7298_v38  ;;  %v5891_v38 = vpack.c.bf16 %v1110_v36, %v1109_v35  ;;  %v3554_v35 = vld [vmem:[%s8268_s3 + $0x1a0] sm:$0xff]  ;;  %v5975_v36 = vpack.c.bf16 %v1315_v33, %v1314_v32  ;;  %v3556_v3 = vld [vmem:[%s8268_s3 + $0x1b0] sm:$0xff]  ;;  %v1700_v32 = vld [vmem:[%s8270_s4 + $0x338] sm:$0xff] }
 0x23c   :  { %5834 = vmatpush3.bf16.msra.mxu1 %v5831_v6  ;;  %4615 = vmatprep.mubr.f32.mxu1 %v895_v7  ;;  %v1124_v6 = vld [vmem:[%s8270_s4 + $0x7a0] sm:$0xff]  ;;  %v1701_v33 = vld [vmem:[%s8270_s4 + $0x3b8] sm:$0xff] }
 0x23d   :  { %5836 = vmatprep.subr.bf16.mxu1 %v5835_v12 }
 0x23e   :  { %6274 = vmatpush3.bf16.msra.mxu0 %v6934_v42 }
 0x23f   :  { %6308 = vmatprep.subr.bf16.mxu0 %v6880_v56 }
 0x240   :  { %5838 = vmatpush3.bf16.msra.mxu1 %v5835_v12  ;;  %v1306_v12 = vld [vmem:[%s8270_s4 + $0x128] sm:$0xff] }
 0x241   :  { %5840 = vmatprep.subr.bf16.mxu1 %v5839_v16  ;;  %5110 = vmatmul.mubr.f32.vlgmr.msra.gmra.mrb[52].mxu0 %v3543_v17  ;;  %v1308_v17 = vld [vmem:[%s8270_s4 + $0x228] sm:$0xff] }
 0x242   :  { %6310 = vmatpush3.bf16.msra.mxu0 %v6880_v56  ;;  %5112 = vmatprep.mubr.f32.mxu0 %v3544_v21  ;;  %v5963_v21 = vpack.c.bf16 %v1309_v18, %v1308_v17  ;;  %v1694_v17 = vld [vmem:[%s8270_s4 + $0x38] sm:$0xff] }
 0x243   :  { %6312 = vmatprep.subr.bf16.mxu0 %v6888_v1  ;;  %v1695_v18 = vld [vmem:[%s8270_s4 + $0xb8] sm:$0xff] }
 0x244   :  { %5842 = vmatpush3.bf16.msra.mxu1 %v5839_v16 }
 0x245   :  { %5844 = vmatprep.subr.bf16.mxu1 %v5843_v22  ;;  %5113 = vmatmul.mubr.f32.gmra.mrb[54].mxu0 %v3545_v25  ;;  %v5967_v25 = vpack.c.bf16 %v1311_v24, %v1310_v23 }
 0x246   :  { %6314 = vmatpush3.bf16.msra.mxu0 %v6888_v1  ;;  %5185 = vmatprep.mubr.f32.mxu0 %v3546_v26  ;;  %v3551_v26 = vld [vmem:[%s8268_s3 + $0x188] sm:$0xff] }
 0x247   :  { %6316 = vmatprep.subr.bf16.mxu0 %v6896_v10 }
 0x248   :  { %5846 = vmatpush3.bf16.msra.mxu1 %v5843_v22 }
 0x249   :  { %5848 = vmatprep.subr.bf16.mxu1 %v5847_v27 }
 0x24a   :  { %6318 = vmatpush3.bf16.msra.mxu0 %v6896_v10 }
 0x24b   :  { %6320 = vmatprep.subr.bf16.mxu0 %v6904_v19 }
 0x24c   :  { %5850 = vmatpush3.bf16.msra.mxu1 %v5847_v27  ;;  %v1312_v27 = vld [vmem:[%s8270_s4 + $0x428] sm:$0xff] }
 0x24d   :  { %5852 = vmatprep.subr.bf16.mxu1 %v5851_v31 }
 0x24e   :  { %6322 = vmatpush3.bf16.msra.mxu0 %v6904_v19 }
 0x24f   :  { %6324 = vmatprep.subr.bf16.mxu0 %v6912_v28 }
 0x250   :  { %5854 = vmatpush3.bf16.msra.mxu1 %v5851_v31  ;;  %v5971_v31 = vpack.c.bf16 %v1313_v29, %v1312_v27  ;;  %v1699_v27 = vld [vmem:[%s8270_s4 + $0x2b8] sm:$0xff] }
 0x251   :  { %5856 = vmatprep.subr.bf16.mxu1 %v5855_v34 }
 0x252   :  { %6326 = vmatpush3.bf16.msra.mxu0 %v6912_v28 }
 0x253   :  { %6328 = vmatprep.subr.bf16.mxu0 %v6920_v37 }
 0x254   :  { %5858 = vmatpush3.bf16.msra.mxu1 %v5855_v34  ;;  %v7456_v41 = vpop.f32.mrb[28].mxu0  ;;  %v3553_v34 = vld [vmem:[%s8268_s3 + $0x198] sm:$0xff] }
 0x255   :  { %5892 = vmatprep.subr.bf16.mxu1 %v5891_v38  ;;  %v1090_v44 = vpop.f32.mrb[29].mxu0 }
 0x256   :  { %6330 = vmatpush3.bf16.msra.mxu0 %v6920_v37 }
 0x257   :  { %4616 = vmatmul.mubr.f32.vlgmr.msra.gmra.mrb[4].mxu1 %v7371_v5  ;;  %6332 = vmatprep.subr.bf16.mxu0 %v6928_v47  ;;  %v1123_v5 = vld [vmem:[%s8270_s4 + $0x720] sm:$0xff] }
 0x258   :  { %5894 = vmatpush3.bf16.msra.mxu1 %v5891_v38  ;;  %4618 = vmatprep.mubr.f32.mxu1 %v7385_v13  ;;  %v7468_v48 = vpop.f32.mrb[30].mxu0  ;;  %v5919_v7 = vpack.c.bf16 %v1124_v6, %v1123_v5  ;;  %v1307_v13 = vld [vmem:[%s8270_s4 + $0x1a8] sm:$0xff]  ;;  %v1509_v5 = vld [vmem:[%s8270_s4 + $0x530] sm:$0xff] }
 0x259   :  { %5896 = vmatprep.subr.bf16.mxu1 %v5895_v43  ;;  %v7470_v50 = vpop.f32.mrb[31].mxu0  ;;  %v5959_v15 = vpack.c.bf16 %v1307_v13, %v1306_v12  ;;  %v1316_v38 = vld [vmem:[%s8270_s4 + $0x628] sm:$0xff]  ;;  %v1510_v6 = vld [vmem:[%s8270_s4 + $0x5b0] sm:$0xff] }
 0x25a   :  { %6334 = vmatpush3.bf16.msra.mxu0 %v6928_v47  ;;  %v5979_v40 = vpack.c.bf16 %v1317_v39, %v1316_v38  ;;  %v1512_v12 = vld [vmem:[%s8270_s4 + $0x6b0] sm:$0xff]  ;;  %v1703_v38 = vld [vmem:[%s8270_s4 + $0x4b8] sm:$0xff] }
 0x25b   :  { %6336 = vmatprep.subr.bf16.mxu0 %v6934_v42  ;;  %4619 = vmatmul.mubr.f32.gmra.mrb[6].mxu1 %v7383_v11  ;;  %v5955_v11 = vpack.c.bf16 %v1305_v9, %v1304_v8  ;;  %v3558_v8 = vld [vmem:[%s8268_s3 + $0x1c0] sm:$0xff]  ;;  %v6039_v9 = vpack.c.bf16 %v1510_v6, %v1509_v5  ;;  %v3560_v39 = vld [vmem:[%s8268_s3 + $0x1d0] sm:$0xff] }
 0x25c   :  { %5898 = vmatpush3.bf16.msra.mxu1 %v5895_v43  ;;  %4691 = vmatprep.mubr.f32.mxu1 %v1090_v44  ;;  %v1319_v43 = vld [vmem:[%s8270_s4 + $0x7a8] sm:$0xff]  ;;  %v1900_v6 = vld [vmem:[%s8270_s4 + $0x5c0] sm:$0xff] }
 0x25d   :  { %5900 = vmatprep.subr.bf16.mxu1 %v5899_v49 }
 0x25e   :  { %6338 = vmatpush3.bf16.msra.mxu0 %v6934_v42 }
 0x25f   :  { %6372 = vmatprep.subr.bf16.mxu0 %v6880_v56 }
 0x260   :  { %5902 = vmatpush3.bf16.msra.mxu1 %v5899_v49  ;;  %v1501_v49 = vld [vmem:[%s8270_s4 + $0x130] sm:$0xff] }
 0x261   :  { %5904 = vmatprep.subr.bf16.mxu1 %v5903_v53  ;;  %5186 = vmatmul.mubr.f32.vlgmr.msra.gmra.mrb[56].mxu0 %v3547_v54  ;;  %v1503_v54 = vld [vmem:[%s8270_s4 + $0x230] sm:$0xff] }
 0x262   :  { %6374 = vmatpush3.bf16.msra.mxu0 %v6880_v56  ;;  %5188 = vmatprep.mubr.f32.mxu0 %v3548_v58  ;;  %v6027_v58 = vpack.c.bf16 %v1504_v55, %v1503_v54  ;;  %v1891_v54 = vld [vmem:[%s8270_s4 + $0x140] sm:$0xff] }
 0x263   :  { %6376 = vmatprep.subr.bf16.mxu0 %v6888_v1 }
 0x264   :  { %5906 = vmatpush3.bf16.msra.mxu1 %v5903_v53 }
 0x265   :  { %5908 = vmatprep.subr.bf16.mxu1 %v5907_v59  ;;  %5189 = vmatmul.mubr.f32.gmra.mrb[58].mxu0 %v3549_v62  ;;  %v6031_v62 = vpack.c.bf16 %v1506_v61, %v1505_v60 }
 0x266   :  { %6378 = vmatpush3.bf16.msra.mxu0 %v6888_v1  ;;  %5261 = vmatprep.mubr.f32.mxu0 %v3550_v63  ;;  %v3555_v63 = vld [vmem:[%s8268_s3 + $0x1a8] sm:$0xff] }
 0x267   :  { %6380 = vmatprep.subr.bf16.mxu0 %v6896_v10 }
 0x268   :  { %5910 = vmatpush3.bf16.msra.mxu1 %v5907_v59 }
 0x269   :  { %5912 = vmatprep.subr.bf16.mxu1 %v5911_v0 }
 0x26a   :  { %6382 = vmatpush3.bf16.msra.mxu0 %v6896_v10 }
 0x26b   :  { %6384 = vmatprep.subr.bf16.mxu0 %v6904_v19 }
 0x26c   :  { %5914 = vmatpush3.bf16.msra.mxu1 %v5911_v0  ;;  %v1507_v0 = vld [vmem:[%s8270_s4 + $0x430] sm:$0xff] }
 0x26d   :  { %5916 = vmatprep.subr.bf16.mxu1 %v5915_v4 }
 0x26e   :  { %6386 = vmatpush3.bf16.msra.mxu0 %v6904_v19 }
 0x26f   :  { %6388 = vmatprep.subr.bf16.mxu0 %v6912_v28 }
 0x270   :  { %5918 = vmatpush3.bf16.msra.mxu1 %v5915_v4  ;;  %v6035_v4 = vpack.c.bf16 %v1508_v2, %v1507_v0  ;;  %v1898_v2 = vld [vmem:[%s8270_s4 + $0x4c0] sm:$0xff] }
 0x271   :  { %5920 = vmatprep.subr.bf16.mxu1 %v5919_v7 }
 0x272   :  { %6390 = vmatpush3.bf16.msra.mxu0 %v6912_v28 }
 0x273   :  { %6392 = vmatprep.subr.bf16.mxu0 %v6920_v37 }
 0x274   :  { %5922 = vmatpush3.bf16.msra.mxu1 %v5919_v7  ;;  %v7541_v14 = vpop.f32.mrb[32].mxu0  ;;  %v3557_v7 = vld [vmem:[%s8268_s3 + $0x1b8] sm:$0xff] }
 0x275   :  { %5956 = vmatprep.subr.bf16.mxu1 %v5955_v11  ;;  %v1285_v16 = vpop.f32.mrb[33].mxu0 }
 0x276   :  { %6394 = vmatpush3.bf16.msra.mxu0 %v6920_v37 }
 0x277   :  { %4692 = vmatmul.mubr.f32.vlgmr.msra.gmra.mrb[4].mxu1 %v7456_v41  ;;  %6396 = vmatprep.subr.bf16.mxu0 %v6928_v47  ;;  %v1318_v41 = vld [vmem:[%s8270_s4 + $0x728] sm:$0xff] }
 0x278   :  { %5958 = vmatpush3.bf16.msra.mxu1 %v5955_v11  ;;  %4694 = vmatprep.mubr.f32.mxu1 %v7470_v50  ;;  %v7553_v20 = vpop.f32.mrb[34].mxu0  ;;  %v5983_v44 = vpack.c.bf16 %v1319_v43, %v1318_v41  ;;  %v1502_v50 = vld [vmem:[%s8270_s4 + $0x1b0] sm:$0xff]  ;;  %v1704_v41 = vld [vmem:[%s8270_s4 + $0x538] sm:$0xff] }
 0x279   :  { %5960 = vmatprep.subr.bf16.mxu1 %v5959_v15  ;;  %v7555_v22 = vpop.f32.mrb[35].mxu0  ;;  %v6023_v52 = vpack.c.bf16 %v1502_v50, %v1501_v49  ;;  %v1511_v11 = vld [vmem:[%s8270_s4 + $0x630] sm:$0xff]  ;;  %v1705_v43 = vld [vmem:[%s8270_s4 + $0x5b8] sm:$0xff] }
 0x27a   :  { %6398 = vmatpush3.bf16.msra.mxu0 %v6928_v47  ;;  %v6043_v13 = vpack.c.bf16 %v1512_v12, %v1511_v11  ;;  %v1709_v50 = vld [vmem:[%s8270_s4 + $0x7b8] sm:$0xff]  ;;  %v1902_v11 = vld [vmem:[%s8270_s4 + $0x6c0] sm:$0xff] }
 0x27b   :  { %6400 = vmatprep.subr.bf16.mxu0 %v6934_v42  ;;  %4695 = vmatmul.mubr.f32.gmra.mrb[6].mxu1 %v7468_v48  ;;  %v6019_v48 = vpack.c.bf16 %v1500_v46, %v1499_v45  ;;  %v3562_v45 = vld [vmem:[%s8268_s3 + $0x1e0] sm:$0xff]  ;;  %v1706_v46 = vld [vmem:[%s8270_s4 + $0x638] sm:$0xff] }
 0x27c   :  { %5962 = vmatpush3.bf16.msra.mxu1 %v5959_v15  ;;  %4767 = vmatprep.mubr.f32.mxu1 %v1285_v16  ;;  %v1514_v15 = vld [vmem:[%s8270_s4 + $0x7b0] sm:$0xff] }
 0x27d   :  { %5964 = vmatprep.subr.bf16.mxu1 %v5963_v21 }
 0x27e   :  { %6402 = vmatpush3.bf16.msra.mxu0 %v6934_v42 }
 0x27f   :  { %6436 = vmatprep.subr.bf16.mxu0 %v6880_v56 }
 0x280   :  { %5966 = vmatpush3.bf16.msra.mxu1 %v5963_v21  ;;  %v1696_v21 = vld [vmem:[%s8270_s4 + $0x138] sm:$0xff] }
 0x281   :  { %5968 = vmatprep.subr.bf16.mxu1 %v5967_v25  ;;  %5262 = vmatmul.mubr.f32.vlgmr.msra.gmra.mrb[60].mxu0 %v3551_v26  ;;  %v1698_v26 = vld [vmem:[%s8270_s4 + $0x238] sm:$0xff] }
 0x282   :  { %6438 = vmatpush3.bf16.msra.mxu0 %v6880_v56  ;;  %5264 = vmatprep.mubr.f32.mxu0 %v3552_v30  ;;  %v6091_v30 = vpack.c.bf16 %v1699_v27, %v1698_v26  ;;  %v2089_v26 = vld [vmem:[%s8270_s4 + $0x2c8] sm:$0xff] }
 0x283   :  { %6440 = vmatprep.subr.bf16.mxu0 %v6888_v1 }
 0x284   :  { %5970 = vmatpush3.bf16.msra.mxu1 %v5967_v25 }
 0x285   :  { %5972 = vmatprep.subr.bf16.mxu1 %v5971_v31  ;;  %5265 = vmatmul.mubr.f32.gmra.mrb[62].mxu0 %v3553_v34  ;;  %v6095_v34 = vpack.c.bf16 %v1701_v33, %v1700_v32  ;;  %v2091_v32 = vld [vmem:[%s8270_s4 + $0x3c8] sm:$0xff] }
 0x286   :  { %6442 = vmatpush3.bf16.msra.mxu0 %v6888_v1  ;;  %5337 = vmatprep.mubr.f32.mxu0 %v3554_v35  ;;  %v3559_v35 = vld [vmem:[%s8268_s3 + $0x1c8] sm:$0xff] }
 0x287   :  { %6444 = vmatprep.subr.bf16.mxu0 %v6896_v10 }
 0x288   :  { %5974 = vmatpush3.bf16.msra.mxu1 %v5971_v31 }
 0x289   :  { %5976 = vmatprep.subr.bf16.mxu1 %v5975_v36 }
 0x28a   :  { %6446 = vmatpush3.bf16.msra.mxu0 %v6896_v10 }
 0x28b   :  { %6448 = vmatprep.subr.bf16.mxu0 %v6904_v19 }
 0x28c   :  { %5978 = vmatpush3.bf16.msra.mxu1 %v5975_v36  ;;  %v1702_v36 = vld [vmem:[%s8270_s4 + $0x438] sm:$0xff] }
 0x28d   :  { %5980 = vmatprep.subr.bf16.mxu1 %v5979_v40 }
 0x28e   :  { %6450 = vmatpush3.bf16.msra.mxu0 %v6904_v19 }
 0x28f   :  { %6452 = vmatprep.subr.bf16.mxu0 %v6912_v28 }
 0x290   :  { %5982 = vmatpush3.bf16.msra.mxu1 %v5979_v40  ;;  %v6099_v40 = vpack.c.bf16 %v1703_v38, %v1702_v36  ;;  %v2094_v38 = vld [vmem:[%s8270_s4 + $0x548] sm:$0xff] }
 0x291   :  { %5984 = vmatprep.subr.bf16.mxu1 %v5983_v44 }
 0x292   :  { %6454 = vmatpush3.bf16.msra.mxu0 %v6912_v28 }
 0x293   :  { %6456 = vmatprep.subr.bf16.mxu0 %v6920_v37 }
 0x294   :  { %5986 = vmatpush3.bf16.msra.mxu1 %v5983_v44  ;;  %v7626_v51 = vpop.f32.mrb[36].mxu0  ;;  %v3561_v44 = vld [vmem:[%s8268_s3 + $0x1d8] sm:$0xff] }
 0x295   :  { %6020 = vmatprep.subr.bf16.mxu1 %v6019_v48  ;;  %v1480_v53 = vpop.f32.mrb[37].mxu0 }
 0x296   :  { %6458 = vmatpush3.bf16.msra.mxu0 %v6920_v37 }
 0x297   :  { %4768 = vmatmul.mubr.f32.vlgmr.msra.gmra.mrb[4].mxu1 %v7541_v14  ;;  %6460 = vmatprep.subr.bf16.mxu0 %v6928_v47  ;;  %v1513_v14 = vld [vmem:[%s8270_s4 + $0x730] sm:$0xff] }
 0x298   :  { %6022 = vmatpush3.bf16.msra.mxu1 %v6019_v48  ;;  %4770 = vmatprep.mubr.f32.mxu1 %v7555_v22  ;;  %v7638_v57 = vpop.f32.mrb[38].mxu0  ;;  %v6047_v16 = vpack.c.bf16 %v1514_v15, %v1513_v14  ;;  %v1697_v22 = vld [vmem:[%s8270_s4 + $0x1b8] sm:$0xff]  ;;  %v1904_v14 = vld [vmem:[%s8270_s4 + $0x7c0] sm:$0xff] }
 0x299   :  { %6024 = vmatprep.subr.bf16.mxu1 %v6023_v52  ;;  %v7640_v59 = vpop.f32.mrb[39].mxu0  ;;  %v6087_v24 = vpack.c.bf16 %v1697_v22, %v1696_v21  ;;  %v1707_v48 = vld [vmem:[%s8270_s4 + $0x6b8] sm:$0xff]  ;;  %v2087_v21 = vld [vmem:[%s8270_s4 + $0x1c8] sm:$0xff] }
 0x29a   :  { %6462 = vmatpush3.bf16.msra.mxu0 %v6928_v47  ;;  %v6107_v49 = vpack.c.bf16 %v1707_v48, %v1706_v46  ;;  %v2279_v48 = vld [vmem:[%s8270_s4 + $0x50] sm:$0xff] }
 0x29b   :  { %6464 = vmatprep.subr.bf16.mxu0 %v6934_v42  ;;  %4771 = vmatmul.mubr.f32.gmra.mrb[6].mxu1 %v7553_v20  ;;  %v6083_v20 = vpack.c.bf16 %v1695_v18, %v1694_v17  ;;  %v2085_v17 = vld [vmem:[%s8270_s4 + $0xc8] sm:$0xff] }
 0x29c   :  { %6026 = vmatpush3.bf16.msra.mxu1 %v6023_v52  ;;  %4843 = vmatprep.mubr.f32.mxu1 %v1480_v53  ;;  %v1889_v52 = vld [vmem:[%s8270_s4 + $0x40] sm:$0xff] }
 0x29d   :  { %6028 = vmatprep.subr.bf16.mxu1 %v6027_v58 }
 0x29e   :  { %6466 = vmatpush3.bf16.msra.mxu0 %v6934_v42 }
 0x29f   :  { %6500 = vmatprep.subr.bf16.mxu0 %v6880_v56 }
 0x2a0   :  { %6030 = vmatpush3.bf16.msra.mxu1 %v6027_v58 }
 0x2a1   :  { %6032 = vmatprep.subr.bf16.mxu1 %v6031_v62  ;;  %5338 = vmatmul.mubr.f32.vlgmr.msra.gmra.mrb[64].mxu0 %v3555_v63  ;;  %v1896_v63 = vld [vmem:[%s8270_s4 + $0x3c0] sm:$0xff] }
 0x2a2   :  { %6502 = vmatpush3.bf16.msra.mxu0 %v6880_v56  ;;  %5340 = vmatprep.mubr.f32.mxu0 %v3556_v3  ;;  %v3563_v3 = vld [vmem:[%s8268_s3 + $0x1e8] sm:$0xff] }
 0x2a3   :  { %6504 = vmatprep.subr.bf16.mxu0 %v6888_v1 }
 0x2a4   :  { %6034 = vmatpush3.bf16.msra.mxu1 %v6031_v62 }
 0x2a5   :  { %6036 = vmatprep.subr.bf16.mxu1 %v6035_v4  ;;  %5341 = vmatmul.mubr.f32.gmra.mrb[66].mxu0 %v3557_v7  ;;  %v3565_v7 = vld [vmem:[%s8268_s3 + $0x1f8] sm:$0xff] }
 0x2a6   :  { %6506 = vmatpush3.bf16.msra.mxu0 %v6888_v1  ;;  %5413 = vmatprep.mubr.f32.mxu0 %v3558_v8 }
 0x2a7   :  { %6508 = vmatprep.subr.bf16.mxu0 %v6896_v10 }
 0x2a8   :  { %6038 = vmatpush3.bf16.msra.mxu1 %v6035_v4  ;;  %v3564_v4 = vld [vmem:[%s8268_s3 + $0x1f0] sm:$0xff] }
 0x2a9   :  { %6040 = vmatprep.subr.bf16.mxu1 %v6039_v9 }
 0x2aa   :  { %6510 = vmatpush3.bf16.msra.mxu0 %v6896_v10 }
 0x2ab   :  { %6512 = vmatprep.subr.bf16.mxu0 %v6904_v19 }
 0x2ac   :  { %6042 = vmatpush3.bf16.msra.mxu1 %v6039_v9  ;;  %v1901_v9 = vld [vmem:[%s8270_s4 + $0x640] sm:$0xff] }
 0x2ad   :  { %6044 = vmatprep.subr.bf16.mxu1 %v6043_v13  ;;  %v6171_v12 = vpack.c.bf16 %v1902_v11, %v1901_v9  ;;  %v2476_v11 = vld [vmem:[%s8270_s4 + $0x158] sm:$0xff] }
 0x2ae   :  { %6514 = vmatpush3.bf16.msra.mxu0 %v6904_v19 }
 0x2af   :  { %6516 = vmatprep.subr.bf16.mxu0 %v6912_v28 }
 0x2b0   :  { %6046 = vmatpush3.bf16.msra.mxu1 %v6043_v13  ;;  %v1903_v13 = vld [vmem:[%s8270_s4 + $0x740] sm:$0xff] }
 0x2b1   :  { %6048 = vmatprep.subr.bf16.mxu1 %v6047_v16  ;;  %v6175_v15 = vpack.c.bf16 %v1904_v14, %v1903_v13 }
 0x2b2   :  { %6518 = vmatpush3.bf16.msra.mxu0 %v6912_v28 }
 0x2b3   :  { %6520 = vmatprep.subr.bf16.mxu0 %v6920_v37 }
 0x2b4   :  { %6050 = vmatpush3.bf16.msra.mxu1 %v6047_v16  ;;  %v7711_v23 = vpop.f32.mrb[40].mxu0  ;;  %v2084_v16 = vld [vmem:[%s8270_s4 + $0x48] sm:$0xff] }
 0x2b5   :  { %6084 = vmatprep.subr.bf16.mxu1 %v6083_v20  ;;  %v1675_v25 = vpop.f32.mrb[41].mxu0  ;;  %v6211_v18 = vpack.c.bf16 %v2085_v17, %v2084_v16  ;;  %v2478_v16 = vld [vmem:[%s8270_s4 + $0x258] sm:$0xff] }
 0x2b6   :  { %6522 = vmatpush3.bf16.msra.mxu0 %v6920_v37  ;;  %v2479_v17 = vld [vmem:[%s8270_s4 + $0x2d8] sm:$0xff] }
 0x2b7   :  { %4844 = vmatmul.mubr.f32.vlgmr.msra.gmra.mrb[4].mxu1 %v7626_v51  ;;  %6524 = vmatprep.subr.bf16.mxu0 %v6928_v47 }
 0x2b8   :  { %6086 = vmatpush3.bf16.msra.mxu1 %v6083_v20  ;;  %4846 = vmatprep.mubr.f32.mxu1 %v7640_v59  ;;  %v7723_v29 = vpop.f32.mrb[42].mxu0  ;;  %v1894_v59 = vld [vmem:[%s8270_s4 + $0x2c0] sm:$0xff]  ;;  %v2086_v20 = vld [vmem:[%s8270_s4 + $0x148] sm:$0xff] }
 0x2b9   :  { %6088 = vmatprep.subr.bf16.mxu1 %v6087_v24  ;;  %v7725_v31 = vpop.f32.mrb[43].mxu0 }
 0x2ba   :  { %6526 = vmatpush3.bf16.msra.mxu0 %v6928_v47 }
 0x2bb   :  { %6528 = vmatprep.subr.bf16.mxu0 %v6934_v42  ;;  %4847 = vmatmul.mubr.f32.gmra.mrb[6].mxu1 %v7638_v57 }
 0x2bc   :  { %6090 = vmatpush3.bf16.msra.mxu1 %v6087_v24  ;;  %4919 = vmatprep.mubr.f32.mxu1 %v1675_v25  ;;  %v2088_v25 = vld [vmem:[%s8270_s4 + $0x248] sm:$0xff] }
 0x2bd   :  { %6092 = vmatprep.subr.bf16.mxu1 %v6091_v30 }
 0x2be   :  { %6530 = vmatpush3.bf16.msra.mxu0 %v6934_v42 }
 0x2bf   :  { %6564 = vmatprep.subr.bf16.mxu0 %v6880_v56 }
 0x2c0   :  { %6094 = vmatpush3.bf16.msra.mxu1 %v6091_v30 }
 0x2c1   :  { %6096 = vmatprep.subr.bf16.mxu1 %v6095_v34  ;;  %5414 = vmatmul.mubr.f32.vlgmr.msra.gmra.mrb[68].mxu0 %v3559_v35  ;;  %v2093_v35 = vld [vmem:[%s8270_s4 + $0x4c8] sm:$0xff] }
 0x2c2   :  { %6566 = vmatpush3.bf16.msra.mxu0 %v6880_v56  ;;  %5416 = vmatprep.mubr.f32.mxu0 %v3560_v39  ;;  %v6103_v56 = vpack.c.bf16 %v1705_v43, %v1704_v41  ;;  %v2095_v39 = vld [vmem:[%s8270_s4 + $0x5c8] sm:$0xff] }
 0x2c3   :  { %6568 = vmatprep.subr.bf16.mxu0 %v6888_v1  ;;  %v2096_v41 = vld [vmem:[%s8270_s4 + $0x648] sm:$0xff] }
 0x2c4   :  { %6098 = vmatpush3.bf16.msra.mxu1 %v6095_v34  ;;  %v2092_v34 = vld [vmem:[%s8270_s4 + $0x448] sm:$0xff] }
 0x2c5   :  { %6100 = vmatprep.subr.bf16.mxu1 %v6099_v40  ;;  %5417 = vmatmul.mubr.f32.gmra.mrb[70].mxu0 %v3561_v44  ;;  %v6227_v36 = vpack.c.bf16 %v2093_v35, %v2092_v34  ;;  %v2097_v43 = vld [vmem:[%s8270_s4 + $0x6c8] sm:$0xff]  ;;  %v2488_v35 = vld [vmem:[%s8270_s4 + $0x758] sm:$0xff] }
 0x2c6   :  { %6570 = vmatpush3.bf16.msra.mxu0 %v6888_v1  ;;  %5489 = vmatprep.mubr.f32.mxu0 %v3562_v45  ;;  %v1708_v1 = vld [vmem:[%s8270_s4 + $0x738] sm:$0xff]  ;;  %v6235_v44 = vpack.c.bf16 %v2097_v43, %v2096_v41  ;;  %v2098_v45 = vld [vmem:[%s8270_s4 + $0x748] sm:$0xff]  ;;  %v2671_v43 = vld [vmem:[%s8270_s4 + $0x160] sm:$0xff] }
 0x2c7   :  { %6572 = vmatprep.subr.bf16.mxu0 %v6896_v10  ;;  %v6111_v51 = vpack.c.bf16 %v1709_v50, %v1708_v1  ;;  %v2281_v50 = vld [vmem:[%s8270_s4 + $0x150] sm:$0xff] }
 0x2c8   :  { %6102 = vmatpush3.bf16.msra.mxu1 %v6099_v40  ;;  %v6231_v40 = vpack.c.bf16 %v2095_v39, %v2094_v38  ;;  %v2669_v39 = vld [vmem:[%s8270_s4 + $0x60] sm:$0xff] }
 0x2c9   :  { %6104 = vmatprep.subr.bf16.mxu1 %v6103_v56 }
 0x2ca   :  { %6574 = vmatpush3.bf16.msra.mxu0 %v6896_v10  ;;  %v1890_v10 = vld [vmem:[%s8270_s4 + $0xc0] sm:$0xff] }
 0x2cb   :  { %6576 = vmatprep.subr.bf16.mxu0 %v6904_v19  ;;  %v6147_v53 = vpack.c.bf16 %v1890_v10, %v1889_v52 }
 0x2cc   :  { %6106 = vmatpush3.bf16.msra.mxu1 %v6103_v56  ;;  %v2099_v56 = vld [vmem:[%s8270_s4 + $0x7c8] sm:$0xff] }
 0x2cd   :  { %6108 = vmatprep.subr.bf16.mxu1 %v6107_v49  ;;  %v6239_v46 = vpack.c.bf16 %v2099_v56, %v2098_v45 }
 0x2ce   :  { %6578 = vmatpush3.bf16.msra.mxu0 %v6904_v19  ;;  %v1892_v19 = vld [vmem:[%s8270_s4 + $0x1c0] sm:$0xff] }
 0x2cf   :  { %6580 = vmatprep.subr.bf16.mxu0 %v6912_v28  ;;  %v6151_v57 = vpack.c.bf16 %v1892_v19, %v1891_v54  ;;  %v2283_v54 = vld [vmem:[%s8270_s4 + $0x250] sm:$0xff] }
 0x2d0   :  { %6110 = vmatpush3.bf16.msra.mxu1 %v6107_v49  ;;  %v2280_v49 = vld [vmem:[%s8270_s4 + $0xd0] sm:$0xff] }
 0x2d1   :  { %6112 = vmatprep.subr.bf16.mxu1 %v6111_v51  ;;  %v6275_v1 = vpack.c.bf16 %v2280_v49, %v2279_v48  ;;  %v2284_v19 = vld [vmem:[%s8270_s4 + $0x2d0] sm:$0xff]  ;;  %v2673_v48 = vld [vmem:[%s8270_s4 + $0x260] sm:$0xff] }
 0x2d2   :  { %6582 = vmatpush3.bf16.msra.mxu0 %v6912_v28  ;;  %v1893_v28 = vld [vmem:[%s8270_s4 + $0x240] sm:$0xff] }
 0x2d3   :  { %6584 = vmatprep.subr.bf16.mxu0 %v6920_v37  ;;  %v6155_v61 = vpack.c.bf16 %v1894_v59, %v1893_v28  ;;  %v2285_v28 = vld [vmem:[%s8270_s4 + $0x350] sm:$0xff]  ;;  %v2674_v49 = vld [vmem:[%s8270_s4 + $0x2e0] sm:$0xff] }
 0x2d4   :  { %6114 = vmatpush3.bf16.msra.mxu1 %v6111_v51  ;;  %v7796_v55 = vpop.f32.mrb[44].mxu0  ;;  %v2282_v51 = vld [vmem:[%s8270_s4 + $0x1d0] sm:$0xff] }
 0x2d5   :  { %6148 = vmatprep.subr.bf16.mxu1 %v6147_v53  ;;  %v1870_v58 = vpop.f32.mrb[45].mxu0  ;;  %v6279_v10 = vpack.c.bf16 %v2282_v51, %v2281_v50  ;;  %v2286_v59 = vld [vmem:[%s8270_s4 + $0x3d0] sm:$0xff]  ;;  %v6411_v50 = vpack.c.bf16 %v2674_v49, %v2673_v48  ;;  %v2879_v48 = vld [vmem:[%s8270_s4 + $0x7e8] sm:$0xff] }
 0x2d6   :  { %6586 = vmatpush3.bf16.msra.mxu0 %v6920_v37  ;;  %v1895_v37 = vld [vmem:[%s8270_s4 + $0x340] sm:$0xff] }
 0x2d7   :  { %4920 = vmatmul.mubr.f32.vlgmr.msra.gmra.mrb[4].mxu1 %v7711_v23  ;;  %6588 = vmatprep.subr.bf16.mxu0 %v6928_v47  ;;  %v6159_v0 = vpack.c.bf16 %v1896_v63, %v1895_v37  ;;  %v6215_v23 = vpack.c.bf16 %v2087_v21, %v2086_v20  ;;  %v2289_v63 = vld [vmem:[%s8270_s4 + $0x550] sm:$0xff]  ;;  %v6347_v20 = vpack.c.bf16 %v2479_v17, %v2478_v16 }
 0x2d8   :  { %6150 = vmatpush3.bf16.msra.mxu1 %v6147_v53  ;;  %4922 = vmatprep.mubr.f32.mxu1 %v7725_v31  ;;  %v4962_v60 = vpop.f32.mrb[46].mxu0  ;;  %v2090_v31 = vld [vmem:[%s8270_s4 + $0x348] sm:$0xff] }
 0x2d9   :  { %6152 = vmatprep.subr.bf16.mxu1 %v6151_v57  ;;  %v1880_v62 = vpop.f32.mrb[47].mxu0  ;;  %v6223_v33 = vpack.c.bf16 %v2091_v32, %v2090_v31  ;;  %v2486_v32 = vld [vmem:[%s8270_s4 + $0x658] sm:$0xff] }
 0x2da   :  { %6590 = vmatpush3.bf16.msra.mxu0 %v6928_v47  ;;  %v1897_v47 = vld [vmem:[%s8270_s4 + $0x440] sm:$0xff] }
 0x2db   :  { %6592 = vmatprep.subr.bf16.mxu0 %v6934_v42  ;;  %4923 = vmatmul.mubr.f32.gmra.mrb[6].mxu1 %v7723_v29  ;;  %v6163_v5 = vpack.c.bf16 %v1898_v2, %v1897_v47  ;;  %v6219_v29 = vpack.c.bf16 %v2089_v26, %v2088_v25  ;;  %v2291_v2 = vld [vmem:[%s8270_s4 + $0x650] sm:$0xff]  ;;  %v2482_v25 = vld [vmem:[%s8270_s4 + $0x458] sm:$0xff] }
 0x2dc   :  { %6154 = vmatpush3.bf16.msra.mxu1 %v6151_v57  ;;  %4995 = vmatprep.mubr.f32.mxu1 %v1870_v58  ;;  %v6283_v57 = vpack.c.bf16 %v2284_v19, %v2283_v54  ;;  %v2483_v26 = vld [vmem:[%s8270_s4 + $0x4d8] sm:$0xff]  ;;  %v3390_v54 = vld [vmem:[%s8271_s7 + $0x8] sm:$0xff]  ;;  %v3391_v19 = vld [vmem:[%s8271_s7 + $0x10] sm:$0xff] }
 0x2dd   :  { %6156 = vmatprep.subr.bf16.mxu1 %v6155_v61 }
 0x2de   :  { %6594 = vmatpush3.bf16.msra.mxu0 %v6934_v42  ;;  %v1899_v42 = vld [vmem:[%s8270_s4 + $0x540] sm:$0xff] }
 0x2df   :  { %v6167_v8 = vpack.c.bf16 %v1900_v6, %v1899_v42  ;;  %v2294_v42 = vld [vmem:[%s8270_s4 + $0x7d0] sm:$0xff] }
 0x2e0   :  { %6158 = vmatpush3.bf16.msra.mxu1 %v6155_v61  ;;  %v2287_v61 = vld [vmem:[%s8270_s4 + $0x450] sm:$0xff] }
 0x2e1   :  { %6160 = vmatprep.subr.bf16.mxu1 %v6159_v0  ;;  %5490 = vmatmul.mubr.f32.vlgmr.msra.gmra.mrb[72].mxu0 %v3563_v3  ;;  %v2292_v3 = vld [vmem:[%s8270_s4 + $0x6d0] sm:$0xff] }
 0x2e2   :  { %5492 = vmatprep.mubr.f32.mxu0 %v3564_v4  ;;  %v6299_v4 = vpack.c.bf16 %v2292_v3, %v2291_v2  ;;  %v3395_v2 = vld [vmem:[%s8271_s7 + $0x30] sm:$0xff]  ;;  %v3396_v3 = vld [vmem:[%s8271_s7 + $0x38] sm:$0xff] }
 0x2e4   :  { %6162 = vmatpush3.bf16.msra.mxu1 %v6159_v0  ;;  %v2290_v0 = vld [vmem:[%s8270_s4 + $0x5d0] sm:$0xff] }
 0x2e5   :  { %6164 = vmatprep.subr.bf16.mxu1 %v6163_v5  ;;  %5493 = vmatmul.mubr.f32.gmra.mrb[74].mxu0 %v3565_v7  ;;  %v6295_v47 = vpack.c.bf16 %v2290_v0, %v2289_v63  ;;  %v2474_v7 = vld [vmem:[%s8270_s4 + $0x58] sm:$0xff]  ;;  %v2679_v63 = vld [vmem:[%s8270_s4 + $0x560] sm:$0xff] }
 0x2e8   :  { %6166 = vmatpush3.bf16.msra.mxu1 %v6163_v5  ;;  %v2293_v5 = vld [vmem:[%s8270_s4 + $0x750] sm:$0xff] }
 0x2e9   :  { %6168 = vmatprep.subr.bf16.mxu1 %v6167_v8  ;;  %v6303_v6 = vpack.c.bf16 %v2294_v42, %v2293_v5  ;;  %v2681_v5 = vld [vmem:[%s8270_s4 + $0x660] sm:$0xff]  ;;  %v6639_v42 = vpack.c.bf16 %v3396_v3, %v3395_v2  ;;  %v3070_v2 = vld [vmem:[%s8270_s4 + $0x5f0] sm:$0xff] }
 0x2ec   :  { %6170 = vmatpush3.bf16.msra.mxu1 %v6167_v8  ;;  %v2475_v8 = vld [vmem:[%s8270_s4 + $0xd8] sm:$0xff] }
 0x2ed   :  { %6172 = vmatprep.subr.bf16.mxu1 %v6171_v12  ;;  %v6339_v9 = vpack.c.bf16 %v2475_v8, %v2474_v7  ;;  %v3397_v7 = vld [vmem:[%s8271_s7 + $0x40] sm:$0xff]  ;;  %v3398_v8 = vld [vmem:[%s8271_s7 + $0x48] sm:$0xff] }
 0x2f0   :  { %6174 = vmatpush3.bf16.msra.mxu1 %v6171_v12  ;;  %v2477_v12 = vld [vmem:[%s8270_s4 + $0x1d8] sm:$0xff] }
 0x2f1   :  { %6176 = vmatprep.subr.bf16.mxu1 %v6175_v15  ;;  %v6343_v14 = vpack.c.bf16 %v2477_v12, %v2476_v11  ;;  %v2683_v11 = vld [vmem:[%s8270_s4 + $0x760] sm:$0xff]  ;;  %v6643_v12 = vpack.c.bf16 %v3398_v8, %v3397_v7  ;;  %v3074_v7 = vld [vmem:[%s8270_s4 + $0x7f0] sm:$0xff] }
 0x2f4   :  { %6178 = vmatpush3.bf16.msra.mxu1 %v6175_v15  ;;  %v5035_v22 = vpop.f32.mrb[48].mxu0 }
 0x2f5   :  { %6212 = vmatprep.subr.bf16.mxu1 %v6211_v18  ;;  %v2065_v24 = vpop.f32.mrb[49].mxu0 }
 0x2f7   :  { %4996 = vmatmul.mubr.f32.vlgmr.msra.gmra.mrb[4].mxu1 %v7796_v55 }
 0x2f8   :  { %6214 = vmatpush3.bf16.msra.mxu1 %v6211_v18  ;;  %4998 = vmatprep.mubr.f32.mxu1 %v1880_v62  ;;  %v5038_v27 = vpop.f32.mrb[50].mxu0  ;;  %v2288_v62 = vld [vmem:[%s8270_s4 + $0x4d0] sm:$0xff] }
 0x2f9   :  { %6216 = vmatprep.subr.bf16.mxu1 %v6215_v23  ;;  %v2075_v30 = vpop.f32.mrb[51].mxu0  ;;  %v6291_v37 = vpack.c.bf16 %v2288_v62, %v2287_v61  ;;  %v3393_v61 = vld [vmem:[%s8271_s7 + $0x20] sm:$0xff]  ;;  %v3394_v62 = vld [vmem:[%s8271_s7 + $0x28] sm:$0xff] }
 0x2fa   :  { %v6635_v0 = vpack.c.bf16 %v3394_v62, %v3393_v61  ;;  %v3066_v61 = vld [vmem:[%s8270_s4 + $0x3f0] sm:$0xff] }
 0x2fb   :  { %4999 = vmatmul.mubr.f32.gmra.mrb[6].mxu1 %v4962_v60  ;;  %v6287_v60 = vpack.c.bf16 %v2286_v59, %v2285_v28  ;;  %v3392_v28 = vld [vmem:[%s8271_s7 + $0x18] sm:$0xff]  ;;  %v2678_v59 = vld [vmem:[%s8270_s4 + $0x4e0] sm:$0xff] }
 0x2fc   :  { %6218 = vmatpush3.bf16.msra.mxu1 %v6215_v23  ;;  %5071 = vmatprep.mubr.f32.mxu1 %v2065_v24  ;;  %v2481_v23 = vld [vmem:[%s8270_s4 + $0x3d8] sm:$0xff] }
 0x2fd   :  { %6220 = vmatprep.subr.bf16.mxu1 %v6219_v29 }
 0x300   :  { %6222 = vmatpush3.bf16.msra.mxu1 %v6219_v29  ;;  %v2484_v29 = vld [vmem:[%s8270_s4 + $0x558] sm:$0xff] }
 0x301   :  { %6224 = vmatprep.subr.bf16.mxu1 %v6223_v33 }
 0x304   :  { %6226 = vmatpush3.bf16.msra.mxu1 %v6223_v33  ;;  %v2487_v33 = vld [vmem:[%s8270_s4 + $0x6d8] sm:$0xff] }
 0x305   :  { %6228 = vmatprep.subr.bf16.mxu1 %v6227_v36  ;;  %v6363_v34 = vpack.c.bf16 %v2487_v33, %v2486_v32  ;;  %v2870_v33 = vld [vmem:[%s8270_s4 + $0x368] sm:$0xff] }
 0x308   :  { %6230 = vmatpush3.bf16.msra.mxu1 %v6227_v36  ;;  %v2489_v36 = vld [vmem:[%s8270_s4 + $0x7d8] sm:$0xff] }
 0x309   :  { %6232 = vmatprep.subr.bf16.mxu1 %v6231_v40  ;;  %v6367_v38 = vpack.c.bf16 %v2489_v36, %v2488_v35  ;;  %v2872_v36 = vld [vmem:[%s8270_s4 + $0x468] sm:$0xff] }
 0x30c   :  { %6234 = vmatpush3.bf16.msra.mxu1 %v6231_v40  ;;  %v2670_v40 = vld [vmem:[%s8270_s4 + $0xe0] sm:$0xff] }
 0x30d   :  { %6236 = vmatprep.subr.bf16.mxu1 %v6235_v44  ;;  %v6403_v41 = vpack.c.bf16 %v2670_v40, %v2669_v39  ;;  %v2874_v40 = vld [vmem:[%s8270_s4 + $0x568] sm:$0xff] }
 0x310   :  { %6238 = vmatpush3.bf16.msra.mxu1 %v6235_v44  ;;  %v2672_v44 = vld [vmem:[%s8270_s4 + $0x1e0] sm:$0xff] }
 0x311   :  { %6240 = vmatprep.subr.bf16.mxu1 %v6239_v46  ;;  %v6407_v56 = vpack.c.bf16 %v2672_v44, %v2671_v43  ;;  %v2876_v44 = vld [vmem:[%s8270_s4 + $0x668] sm:$0xff] }
 0x314   :  { %6242 = vmatpush3.bf16.msra.mxu1 %v6239_v46  ;;  %v5111_v52 = vpop.f32.mrb[52].mxu0 }
 0x315   :  { %6276 = vmatprep.subr.bf16.mxu1 %v6275_v1  ;;  %v2260_v53 = vpop.f32.mrb[53].mxu0 }
 0x317   :  { %5072 = vmatmul.mubr.f32.vlgmr.msra.gmra.mrb[4].mxu1 %v5035_v22  ;;  %v2480_v22 = vld [vmem:[%s8270_s4 + $0x358] sm:$0xff] }
 0x318   :  { %6278 = vmatpush3.bf16.msra.mxu1 %v6275_v1  ;;  %5074 = vmatprep.mubr.f32.mxu1 %v2075_v30  ;;  %v5114_v55 = vpop.f32.mrb[54].mxu0  ;;  %v6351_v24 = vpack.c.bf16 %v2481_v23, %v2480_v22  ;;  %v2485_v30 = vld [vmem:[%s8270_s4 + $0x5d8] sm:$0xff]  ;;  %v2866_v22 = vld [vmem:[%s8270_s4 + $0x168] sm:$0xff] }
 0x319   :  { %6280 = vmatprep.subr.bf16.mxu1 %v6279_v10  ;;  %v2270_v58 = vpop.f32.mrb[55].mxu0  ;;  %v6359_v31 = vpack.c.bf16 %v2485_v30, %v2484_v29  ;;  %v2867_v23 = vld [vmem:[%s8270_s4 + $0x1e8] sm:$0xff] }
 0x31a   :  { %v2869_v29 = vld [vmem:[%s8270_s4 + $0x2e8] sm:$0xff] }
 0x31b   :  { %5075 = vmatmul.mubr.f32.gmra.mrb[6].mxu1 %v5038_v27  ;;  %v6355_v27 = vpack.c.bf16 %v2483_v26, %v2482_v25  ;;  %v6471_v25 = vpack.c.bf16 %v2867_v23, %v2866_v22 }
 0x31c   :  { %6282 = vmatpush3.bf16.msra.mxu1 %v6279_v10  ;;  %5147 = vmatprep.mubr.f32.mxu1 %v2260_v53  ;;  %v2676_v10 = vld [vmem:[%s8270_s4 + $0x3e0] sm:$0xff] }
 0x31d   :  { %6284 = vmatprep.subr.bf16.mxu1 %v6283_v57  ;;  %v3389_v53 = vld [vmem:[%s8271_s7] sm:$0xff] }
 0x320   :  { %6286 = vmatpush3.bf16.msra.mxu1 %v6283_v57  ;;  %v2677_v57 = vld [vmem:[%s8270_s4 + $0x460] sm:$0xff] }
 0x321   :  { %6288 = vmatprep.subr.bf16.mxu1 %v6287_v60 }
 0x324   :  { %6290 = vmatpush3.bf16.msra.mxu1 %v6287_v60  ;;  %v6631_v60 = vpack.c.bf16 %v3392_v28, %v3391_v19 }
 0x325   :  { %6292 = vmatprep.subr.bf16.mxu1 %v6291_v37 }
 0x328   :  { %6294 = vmatpush3.bf16.msra.mxu1 %v6291_v37  ;;  %v6419_v37 = vpack.c.bf16 %v2678_v59, %v2677_v57  ;;  %v3064_v57 = vld [vmem:[%s8270_s4 + $0x2f0] sm:$0xff] }
 0x329   :  { %6296 = vmatprep.subr.bf16.mxu1 %v6295_v47 }
 0x32c   :  { %6298 = vmatpush3.bf16.msra.mxu1 %v6295_v47  ;;  %v2680_v47 = vld [vmem:[%s8270_s4 + $0x5e0] sm:$0xff] }
 0x32d   :  { %6300 = vmatprep.subr.bf16.mxu1 %v6299_v4 }
 0x330   :  { %6302 = vmatpush3.bf16.msra.mxu1 %v6299_v4  ;;  %v6423_v4 = vpack.c.bf16 %v2680_v47, %v2679_v63  ;;  %v3068_v63 = vld [vmem:[%s8270_s4 + $0x4f0] sm:$0xff] }
 0x331   :  { %6304 = vmatprep.subr.bf16.mxu1 %v6303_v6  ;;  %v3069_v47 = vld [vmem:[%s8270_s4 + $0x570] sm:$0xff] }
 0x332   :  { %v6551_v3 = vpack.c.bf16 %v3070_v2, %v3069_v47  ;;  %v3568_v2 = vld [vmem:[%s8274_s8] ss:$0 sm:$0xff] }
 0x334   :  { %6306 = vmatpush3.bf16.msra.mxu1 %v6303_v6  ;;  %v5187_v13 = vpop.f32.mrb[56].mxu0  ;;  %v2682_v6 = vld [vmem:[%s8270_s4 + $0x6e0] sm:$0xff] }
 0x335   :  { %6340 = vmatprep.subr.bf16.mxu1 %v6339_v9  ;;  %v2455_v15 = vpop.f32.mrb[57].mxu0 }
 0x337   :  { %5148 = vmatmul.mubr.f32.vlgmr.msra.gmra.mrb[4].mxu1 %v5111_v52  ;;  %v2675_v52 = vld [vmem:[%s8270_s4 + $0x360] sm:$0xff] }
 0x338   :  { %6342 = vmatpush3.bf16.msra.mxu1 %v6339_v9  ;;  %5150 = vmatprep.mubr.f32.mxu1 %v2270_v58  ;;  %v5190_v18 = vpop.f32.mrb[58].mxu0  ;;  %v6627_v58 = vpack.c.bf16 %v3390_v54, %v3389_v53  ;;  %v6427_v9 = vpack.c.bf16 %v2682_v6, %v2681_v5  ;;  %v3072_v5 = vld [vmem:[%s8270_s4 + $0x6f0] sm:$0xff] }
 0x339   :  { %6344 = vmatprep.subr.bf16.mxu1 %v6343_v14  ;;  %v2465_v21 = vpop.f32.mrb[59].mxu0  ;;  %v3073_v6 = vld [vmem:[%s8270_s4 + $0x770] sm:$0xff] }
 0x33a   :  { %6628 = vmatprep.subr.bf16.mxu0 %v6627_v58  ;;  %v6559_v8 = vpack.c.bf16 %v3074_v7, %v3073_v6 }
 0x33b   :  { %5151 = vmatmul.mubr.f32.gmra.mrb[6].mxu1 %v5114_v55  ;;  %v6415_v55 = vpack.c.bf16 %v2676_v10, %v2675_v52  ;;  %6630 = vmatpush3.bf16.msra.mxu0 %v6627_v58  ;;  %v3061_v52 = vld [vmem:[%s8270_s4 + $0x170] sm:$0xff] }
 0x33c   :  { %6346 = vmatpush3.bf16.msra.mxu1 %v6343_v14  ;;  %5223 = vmatprep.mubr.f32.mxu1 %v2455_v15  ;;  %v3399_v14 = vld [vmem:[%s8271_s7 + $0x50] sm:$0xff]  ;;  %v3400_v15 = vld [vmem:[%s8271_s7 + $0x58] sm:$0xff] }
 0x33d   :  { %6348 = vmatprep.subr.bf16.mxu1 %v6347_v20  ;;  %6632 = vmatprep.subr.bf16.mxu0 %v6631_v60  ;;  %v6647_v17 = vpack.c.bf16 %v3400_v15, %v3399_v14  ;;  %v3062_v10 = vld [vmem:[%s8270_s4 + $0x1f0] sm:$0xff]  ;;  %v3257_v14 = vld [vmem:[%s8270_s4 + $0x1f8] sm:$0xff] }
 0x33e   :  { %v6535_v54 = vpack.c.bf16 %v3062_v10, %v3061_v52 }
 0x33f   :  { %6634 = vmatpush3.bf16.msra.mxu0 %v6631_v60  ;;  %v3065_v60 = vld [vmem:[%s8270_s4 + $0x370] sm:$0xff] }
 0x340   :  { %6350 = vmatpush3.bf16.msra.mxu1 %v6347_v20  ;;  %6636 = vmatprep.subr.bf16.mxu0 %v6635_v0  ;;  %v2865_v20 = vld [vmem:[%s8270_s4 + $0xe8] sm:$0xff]  ;;  %v6543_v62 = vpack.c.bf16 %v3066_v61, %v3065_v60 }
 0x341   :  { %6352 = vmatprep.subr.bf16.mxu1 %v6351_v24 }
 0x343   :  { %6638 = vmatpush3.bf16.msra.mxu0 %v6635_v0 }
 0x344   :  { %6354 = vmatpush3.bf16.msra.mxu1 %v6351_v24  ;;  %6640 = vmatprep.subr.bf16.mxu0 %v6639_v42 }
 0x345   :  { %6356 = vmatprep.subr.bf16.mxu1 %v6355_v27 }
 0x347   :  { %6642 = vmatpush3.bf16.msra.mxu0 %v6639_v42 }
 0x348   :  { %6358 = vmatpush3.bf16.msra.mxu1 %v6355_v27  ;;  %6644 = vmatprep.subr.bf16.mxu0 %v6643_v12  ;;  %v2868_v27 = vld [vmem:[%s8270_s4 + $0x268] sm:$0xff] }
 0x349   :  { %6360 = vmatprep.subr.bf16.mxu1 %v6359_v31 }
 0x34b   :  { %6646 = vmatpush3.bf16.msra.mxu0 %v6643_v12 }
 0x34c   :  { %6362 = vmatpush3.bf16.msra.mxu1 %v6359_v31  ;;  %6648 = vmatprep.subr.bf16.mxu0 %v6647_v17  ;;  %v6475_v31 = vpack.c.bf16 %v2869_v29, %v2868_v27  ;;  %v3262_v27 = vld [vmem:[%s8270_s4 + $0x478] sm:$0xff] }
 0x34d   :  { %6364 = vmatprep.subr.bf16.mxu1 %v6363_v34  ;;  %v3263_v29 = vld [vmem:[%s8270_s4 + $0x4f8] sm:$0xff] }
 0x34f   :  { %6650 = vmatpush3.bf16.msra.mxu0 %v6647_v17 }
 0x350   :  { %6366 = vmatpush3.bf16.msra.mxu1 %v6363_v34  ;;  %v2871_v34 = vld [vmem:[%s8270_s4 + $0x3e8] sm:$0xff] }
 0x351   :  { %6368 = vmatprep.subr.bf16.mxu1 %v6367_v38  ;;  %v6479_v35 = vpack.c.bf16 %v2871_v34, %v2870_v33  ;;  %v3266_v34 = vld [vmem:[%s8270_s4 + $0x678] sm:$0xff] }
 0x354   :  { %6370 = vmatpush3.bf16.msra.mxu1 %v6367_v38  ;;  %v8008_v45 = vpop.f32.mrb[60].mxu0  ;;  %v2873_v38 = vld [vmem:[%s8270_s4 + $0x4e8] sm:$0xff] }
 0x355   :  { %6404 = vmatprep.subr.bf16.mxu1 %v6403_v41  ;;  %v2650_v46 = vpop.f32.mrb[61].mxu0  ;;  %v6483_v39 = vpack.c.bf16 %v2873_v38, %v2872_v36  ;;  %v3268_v38 = vld [vmem:[%s8270_s4 + $0x778] sm:$0xff] }
 0x357   :  { %5224 = vmatmul.mubr.f32.vlgmr.msra.gmra.mrb[4].mxu1 %v5187_v13  ;;  %v2684_v13 = vld [vmem:[%s8270_s4 + $0x7e0] sm:$0xff] }
 0x358   :  { %6406 = vmatpush3.bf16.msra.mxu1 %v6403_v41  ;;  %5226 = vmatprep.mubr.f32.mxu1 %v2465_v21  ;;  %v8016_v1 = vpop.f32.mrb[62].mxu0  ;;  %v6431_v16 = vpack.c.bf16 %v2684_v13, %v2683_v11  ;;  %v2875_v41 = vld [vmem:[%s8270_s4 + $0x5e8] sm:$0xff]  ;;  %v3255_v11 = vld [vmem:[%s8270_s4 + $0xf8] sm:$0xff] }
 0x359   :  { %6408 = vmatprep.subr.bf16.mxu1 %v6407_v56  ;;  %v8018_v51 = vpop.f32.mrb[63].mxu0  ;;  %v6487_v43 = vpack.c.bf16 %v2875_v41, %v2874_v40  ;;  %v3256_v13 = vld [vmem:[%s8270_s4 + $0x178] sm:$0xff]  ;;  %v3401_v41 = vld [vmem:[%s8271_s7 + $0x60] sm:$0xff] }
 0x35b   :  { %5227 = vmatmul.mubr.f32.gmra.mrb[6].mxu1 %v5190_v18  ;;  %v2864_v18 = vld [vmem:[%s8270_s4 + $0x68] sm:$0xff] }
 0x35c   :  { %6410 = vmatpush3.bf16.msra.mxu1 %v6407_v56  ;;  %5299 = vmatprep.mubr.f32.mxu1 %v2650_v46  ;;  %v6467_v21 = vpack.c.bf16 %v2865_v20, %v2864_v18  ;;  %v2878_v46 = vld [vmem:[%s8270_s4 + $0x768] sm:$0xff]  ;;  %v3258_v18 = vld [vmem:[%s8270_s4 + $0x278] sm:$0xff] }
 0x35d   :  { %6412 = vmatprep.subr.bf16.mxu1 %v6411_v50  ;;  %v6495_v49 = vpack.c.bf16 %v2879_v48, %v2878_v46  ;;  %v3259_v20 = vld [vmem:[%s8270_s4 + $0x2f8] sm:$0xff]  ;;  %v3566_v48 = vld [vmem:[%s8272_s5] ss:$0 sm:$0xff] }
 0x35e   :  { %v6603_v22 = vpack.c.bf16 %v3259_v20, %v3258_v18 }
 0x360   :  { %6414 = vmatpush3.bf16.msra.mxu1 %v6411_v50  ;;  %v3060_v50 = vld [vmem:[%s8270_s4 + $0xf0] sm:$0xff] }
 0x361   :  { %6416 = vmatprep.subr.bf16.mxu1 %v6415_v55 }
 0x364   :  { %6418 = vmatpush3.bf16.msra.mxu1 %v6415_v55  ;;  %v3063_v55 = vld [vmem:[%s8270_s4 + $0x270] sm:$0xff] }
 0x365   :  { %6420 = vmatprep.subr.bf16.mxu1 %v6419_v37  ;;  %v6539_v28 = vpack.c.bf16 %v3064_v57, %v3063_v55 }
 0x368   :  { %6422 = vmatpush3.bf16.msra.mxu1 %v6419_v37  ;;  %v3067_v37 = vld [vmem:[%s8270_s4 + $0x470] sm:$0xff] }
 0x369   :  { %6424 = vmatprep.subr.bf16.mxu1 %v6423_v4  ;;  %v6547_v0 = vpack.c.bf16 %v3068_v63, %v3067_v37 }
 0x36c   :  { %6426 = vmatpush3.bf16.msra.mxu1 %v6423_v4  ;;  %v3071_v4 = vld [vmem:[%s8270_s4 + $0x670] sm:$0xff] }
 0x36d   :  { %6428 = vmatprep.subr.bf16.mxu1 %v6427_v9  ;;  %v6555_v42 = vpack.c.bf16 %v3072_v5, %v3071_v4 }
 0x370   :  { %6430 = vmatpush3.bf16.msra.mxu1 %v6427_v9  ;;  %v3254_v9 = vld [vmem:[%s8270_s4 + $0x78] sm:$0xff] }
 0x371   :  { %6432 = vmatprep.subr.bf16.mxu1 %v6431_v16  ;;  %v6595_v12 = vpack.c.bf16 %v3255_v11, %v3254_v9 }
 0x374   :  { %6434 = vmatpush3.bf16.msra.mxu1 %v6431_v16  ;;  %v5339_v24 = vpop.f32.mrb[64].mxu0  ;;  %v6599_v16 = vpack.c.bf16 %v3257_v14, %v3256_v13 }
 0x375   :  { %6468 = vmatprep.subr.bf16.mxu1 %v6467_v21  ;;  %v2845_v26 = vpop.f32.mrb[65].mxu0 }
 0x377   :  { %5300 = vmatmul.mubr.f32.vlgmr.msra.gmra.mrb[4].mxu1 %v8008_v45  ;;  %v2877_v45 = vld [vmem:[%s8270_s4 + $0x6e8] sm:$0xff] }
 0x378   :  { %6470 = vmatpush3.bf16.msra.mxu1 %v6467_v21  ;;  %5302 = vmatprep.mubr.f32.mxu1 %v8018_v51  ;;  %v5342_v30 = vpop.f32.mrb[66].mxu0  ;;  %v6491_v56 = vpack.c.bf16 %v2877_v45, %v2876_v44  ;;  %v3403_v45 = vld [vmem:[%s8271_s7 + $0x70] sm:$0xff] }
 0x379   :  { %6472 = vmatprep.subr.bf16.mxu1 %v6471_v25  ;;  %v2855_v32 = vpop.f32.mrb[67].mxu0 }
 0x37b   :  { %5303 = vmatmul.mubr.f32.gmra.mrb[6].mxu1 %v8016_v1  ;;  %v3059_v1 = vld [vmem:[%s8270_s4 + $0x70] sm:$0xff] }
 0x37c   :  { %6474 = vmatpush3.bf16.msra.mxu1 %v6471_v25  ;;  %5375 = vmatprep.mubr.f32.mxu1 %v2845_v26  ;;  %v6531_v51 = vpack.c.bf16 %v3060_v50, %v3059_v1  ;;  %v3261_v25 = vld [vmem:[%s8270_s4 + $0x3f8] sm:$0xff]  ;;  %v3567_v1 = vld [vmem:[%s8273_s6] ss:$0 sm:$0xff] }
 0x37d   :  { %6476 = vmatprep.subr.bf16.mxu1 %v6475_v31 }
 0x380   :  { %6478 = vmatpush3.bf16.msra.mxu1 %v6475_v31  ;;  %v3264_v31 = vld [vmem:[%s8270_s4 + $0x578] sm:$0xff] }
 0x381   :  { %6480 = vmatprep.subr.bf16.mxu1 %v6479_v35 }
 0x384   :  { %6482 = vmatpush3.bf16.msra.mxu1 %v6479_v35  ;;  %v3267_v35 = vld [vmem:[%s8270_s4 + $0x6f8] sm:$0xff] }
 0x385   :  { %6484 = vmatprep.subr.bf16.mxu1 %v6483_v39  ;;  %v6619_v36 = vpack.c.bf16 %v3267_v35, %v3266_v34 }
 0x388   :  { %6486 = vmatpush3.bf16.msra.mxu1 %v6483_v39  ;;  %v3269_v39 = vld [vmem:[%s8270_s4 + $0x7f8] sm:$0xff] }
 0x389   :  { %6488 = vmatprep.subr.bf16.mxu1 %v6487_v43  ;;  %v6623_v40 = vpack.c.bf16 %v3269_v39, %v3268_v38 }
 0x38c   :  { %6490 = vmatpush3.bf16.msra.mxu1 %v6487_v43  ;;  %v3402_v43 = vld [vmem:[%s8271_s7 + $0x68] sm:$0xff] }
 0x38d   :  { %6492 = vmatprep.subr.bf16.mxu1 %v6491_v56  ;;  %v6651_v44 = vpack.c.bf16 %v3402_v43, %v3401_v41 }
 0x38f   :  { %6652 = vmatprep.subr.bf16.mxu0 %v6651_v44 }
 0x390   :  { %6494 = vmatpush3.bf16.msra.mxu1 %v6491_v56  ;;  %6654 = vmatpush3.bf16.msra.mxu0 %v6651_v44  ;;  %v3404_v56 = vld [vmem:[%s8271_s7 + $0x78] sm:$0xff] }
 0x391   :  { %6496 = vmatprep.subr.bf16.mxu1 %v6495_v49  ;;  %v6655_v46 = vpack.c.bf16 %v3404_v56, %v3403_v45 }
 0x393   :  { %6656 = vmatprep.subr.bf16.mxu0 %v6655_v46 }
 0x394   :  { %6498 = vmatpush3.bf16.msra.mxu1 %v6495_v49  ;;  %v5415_v53 = vpop.f32.mrb[68].mxu0  ;;  %6658 = vmatpush3.bf16.msra.mxu0 %v6655_v46 }
 0x395   :  { %6532 = vmatprep.subr.bf16.mxu1 %v6531_v51  ;;  %v3040_v19 = vpop.f32.mrb[69].mxu0 }
 0x397   :  { %5376 = vmatmul.mubr.f32.vlgmr.msra.gmra.mrb[4].mxu1 %v5339_v24  ;;  %v3260_v24 = vld [vmem:[%s8270_s4 + $0x378] sm:$0xff] }
 0x398   :  { %6534 = vmatpush3.bf16.msra.mxu1 %v6531_v51  ;;  %5378 = vmatprep.mubr.f32.mxu1 %v2855_v32  ;;  %v5418_v58 = vpop.f32.mrb[70].mxu0  ;;  %v6607_v26 = vpack.c.bf16 %v3261_v25, %v3260_v24  ;;  %v3265_v32 = vld [vmem:[%s8270_s4 + $0x5f8] sm:$0xff] }
 0x399   :  { %6536 = vmatprep.subr.bf16.mxu1 %v6535_v54  ;;  %v3050_v59 = vpop.f32.mrb[71].mxu0  ;;  %v6615_v33 = vpack.c.bf16 %v3265_v32, %v3264_v31 }
 0x39b   :  { %5379 = vmatmul.mubr.f32.gmra.mrb[6].mxu1 %v5342_v30  ;;  %v6611_v30 = vpack.c.bf16 %v3263_v29, %v3262_v27 }
 0x39c   :  { %6538 = vmatpush3.bf16.msra.mxu1 %v6535_v54  ;;  %5451 = vmatprep.mubr.f32.mxu1 %v3040_v19 }
 0x39d   :  { %6540 = vmatprep.subr.bf16.mxu1 %v6539_v28 }
 0x3a0   :  { %6542 = vmatpush3.bf16.msra.mxu1 %v6539_v28 }
 0x3a1   :  { %6544 = vmatprep.subr.bf16.mxu1 %v6543_v62 }
 0x3a4   :  { %6546 = vmatpush3.bf16.msra.mxu1 %v6543_v62 }
 0x3a5   :  { %6548 = vmatprep.subr.bf16.mxu1 %v6547_v0 }
 0x3a8   :  { %6550 = vmatpush3.bf16.msra.mxu1 %v6547_v0 }
 0x3a9   :  { %6552 = vmatprep.subr.bf16.mxu1 %v6551_v3 }
 0x3ac   :  { %6554 = vmatpush3.bf16.msra.mxu1 %v6551_v3 }
 0x3ad   :  { %6556 = vmatprep.subr.bf16.mxu1 %v6555_v42 }
 0x3b0   :  { %6558 = vmatpush3.bf16.msra.mxu1 %v6555_v42 }
 0x3b1   :  { %6560 = vmatprep.subr.bf16.mxu1 %v6559_v8 }
 0x3b4   :  { %6562 = vmatpush3.bf16.msra.mxu1 %v6559_v8  ;;  %v5491_v15 = vpop.f32.mrb[72].mxu0 }
 0x3b5   :  { %6596 = vmatprep.subr.bf16.mxu1 %v6595_v12  ;;  %v3235_v17 = vpop.f32.mrb[73].mxu0 }
 0x3b7   :  { %5452 = vmatmul.mubr.f32.vlgmr.msra.gmra.mrb[4].mxu1 %v5415_v53 }
 0x3b8   :  { %6598 = vmatpush3.bf16.msra.mxu1 %v6595_v12  ;;  %5454 = vmatprep.mubr.f32.mxu1 %v3050_v59  ;;  %v5494_v21 = vpop.f32.mrb[74].mxu0 }
 0x3b9   :  { %6600 = vmatprep.subr.bf16.mxu1 %v6599_v16  ;;  %v3245_v23 = vpop.f32.mrb[75].mxu0 }
 0x3bb   :  { %5455 = vmatmul.mubr.f32.gmra.mrb[6].mxu1 %v5418_v58 }
 0x3bc   :  { %6602 = vmatpush3.bf16.msra.mxu1 %v6599_v16  ;;  %5527 = vmatprep.mubr.f32.mxu1 %v3235_v17 }
 0x3bd   :  { %6604 = vmatprep.subr.bf16.mxu1 %v6603_v22 }
 0x3c0   :  { %6606 = vmatpush3.bf16.msra.mxu1 %v6603_v22 }
 0x3c1   :  { %6608 = vmatprep.subr.bf16.mxu1 %v6607_v26 }
 0x3c4   :  { %6610 = vmatpush3.bf16.msra.mxu1 %v6607_v26 }
 0x3c5   :  { %6612 = vmatprep.subr.bf16.mxu1 %v6611_v30 }
 0x3c8   :  { %6614 = vmatpush3.bf16.msra.mxu1 %v6611_v30 }
 0x3c9   :  { %6616 = vmatprep.subr.bf16.mxu1 %v6615_v33 }
 0x3cc   :  { %6618 = vmatpush3.bf16.msra.mxu1 %v6615_v33 }
 0x3cd   :  { %6620 = vmatprep.subr.bf16.mxu1 %v6619_v36 }
 0x3d0   :  { %6622 = vmatpush3.bf16.msra.mxu1 %v6619_v36 }
 0x3d1   :  { %6624 = vmatprep.subr.bf16.mxu1 %v6623_v40 }
 0x3d4   :  { %6626 = vmatpush3.bf16.msra.mxu1 %v6623_v40 }
 0x3d7   :  { %5528 = vmatmul.mubr.f32.vlgmr.msra.gmra.mrb[4].mxu1 %v5491_v15 }
 0x3d8   :  { %5530 = vmatprep.mubr.f32.mxu1 %v3245_v23 }
 0x3db   :  { %5531 = vmatmul.mubr.f32.gmra.mrb[6].mxu1 %v5494_v21 }
 0x4aa   :  { %v5529_v49 = vpop.f32.mrb[4].mxu1 }
 0x4ab   :  { %v3367_v50 = vmul.f32 %v5529_v49, %v3566_v48  ;;  %v3336_v51 = vpop.f32.mrb[5].mxu1 }
 0x4ac   :  { %v3366_v52 = vmul.f32 %v3566_v48, %v3336_v51 }
 0x4ad   :  { %v3378_v10 = vadd.f32 %v3567_v1, %v3367_v50 }
 0x4ae   :  { %v3377_v53 = vadd.f32 %v3567_v1, %v3366_v52  ;;  %v5532_v54 = vpop.f32.mrb[6].mxu1 }
 0x4af   :  { %v3382_v19 = vmul.f32 0.2, %v3378_v10  ;;  %v3369_v55 = vmul.f32 %v5532_v54, %v3566_v48  ;;  %v3346_v57 = vpop.f32.mrb[7].mxu1 }
 0x4b0   :  { %v3381_v58 = vmul.f32 0.2, %v3377_v53  ;;  %v3368_v28 = vmul.f32 %v3566_v48, %v3346_v57 }
 0x4b1   :  { %v3380_v59 = vadd.f32 %v3567_v1, %v3369_v55  ;;  %v3386_v62 = vmax.f32 %v3378_v10, %v3382_v19 }
 0x4b2   :  { %v3379_v60 = vadd.f32 %v3567_v1, %v3368_v28  ;;  %v3385_v61 = vmax.f32 %v3377_v53, %v3381_v58 }
 0x4b3   :  { %v3384_v37 = vmul.f32 0.2, %v3380_v59 }
 0x4b4   :  { %v3383_v63 = vmul.f32 0.2, %v3379_v60  ;;  %5565 = vmatprep.mubr.f32.mxu0 %v3385_v61 }
 0x4b5   :  { %5566 = vmatmul.mubr.f32.vlgmr.msra.gmra.mrb[76].mxu0 %v3386_v62  ;;  %v3388_v47 = vmax.f32 %v3380_v59, %v3384_v37 }
 0x4b6   :  { %v3387_v0 = vmax.f32 %v3379_v60, %v3383_v63 }
 0x4b8   :  { %5568 = vmatprep.mubr.f32.mxu0 %v3387_v0 }
 0x4b9   :  { %5569 = vmatmul.mubr.f32.gmra.mrb[78].mxu0 %v3388_v47 }
 0x588   :  { %v5567_v3 = vpop.f32.mrb[76].mxu0 }
 0x589   :  { %v3484_v4 = vadd.f32 %v5567_v3, %v3568_v2  ;;  %v3478_v5 = vpop.f32.mrb[77].mxu0 }
 0x58a   :  { %v3479_v42 = vadd.f32 %v3568_v2, %v3478_v5 }
 0x58b   :  { %3498 = vst [vmem:[%s8275_s9 + $0x8] sm:$0xff] %v3484_v4 }
 0x58c   :  { %3497 = vst [vmem:[%s8275_s9] sm:$0xff] %v3479_v42  ;;  %v5570_v6 = vpop.f32.mrb[78].mxu0 }
 0x58d   :  { %v3494_v7 = vadd.f32 %v5570_v6, %v3568_v2  ;;  %v3488_v8 = vpop.f32.mrb[79].mxu0 }
 0x58e   :  { %v3489_v9 = vadd.f32 %v3568_v2, %v3488_v8 }
 0x58f   :  { %3500 = vst [vmem:[%s8275_s9 + $0x18] sm:$0xff] %v3494_v7 }
 0x590   :  { %3499 = vst [vmem:[%s8275_s9 + $0x10] sm:$0xff] %v3489_v9 }

</bundles_post_ra>
